<compile_context>
chip_gen: v7x
topology: tpu7x:2x2x1
jax: 0.10.0
libtpu: 0.0.40
codegen_flags: <defaults>
</compile_context>

<pallas_src>
import functools

import numpy as np

import jax
import jax.numpy as jnp
from jax import lax
from jax.experimental import pallas as pl
from jax.experimental.pallas import tpu as pltpu

LANES = 128   # TPU lane width
TB = 8        # images per grid step (batch padded up to a multiple of this)
KPAD = 256    # conv1 contraction dim: 5 rows * 28 cols = 140, zero-padded to 256


# ---------------------------------------------------------------------------
# Fused Pallas kernel: one grid step == TB images.
# ---------------------------------------------------------------------------
def _gennet_kernel(xr_ref, w1_ref, b1_ref, w2_ref, b2_ref, p_ref,
                   fw1_ref, fb1_ref, fw2_ref, fb2_ref, out_ref, *, tb):
    f32 = jnp.float32
    bf16 = jnp.bfloat16

    # ---- conv1 + ReLU + 2x2 max-pool --------------------------------------
    # 4 banded matmuls (row parity dh x col parity dw).  LHS rows are ordered
    # (pooled_row i, image b) so everything downstream slices at multiples of
    # tb (=8) -> no unaligned sublane copies anywhere.
    ymax = None
    for dh in range(2):
        lhs = xr_ref[dh, 0]                                   # (16*tb, KPAD) bf16
        for dw in range(2):
            y = jnp.dot(lhs, w1_ref[dw], preferred_element_type=f32)
            ymax = y if ymax is None else jnp.maximum(ymax, y)
    h1 = jnp.maximum(ymax + b1_ref[...], 0.0)                 # (16*tb, 128) f32
    # h1 row = i*tb + b (i = pooled row, 12 real + 4 pad), lane = j*6 + ci.

    # ---- conv2 + ReLU -------------------------------------------------------
    # 5 banded matmuls (one per kh); kw is folded into the weight band so the
    # output lane is ow*16 + co.  All LHS slice starts (kh*tb) are 8-aligned.
    acc2 = jnp.zeros((8 * tb, LANES), f32)
    for kh in range(5):
        lhs2 = h1[kh * tb:(kh + 8) * tb, :].astype(bf16)      # (8*tb, 128)
        acc2 = acc2 + jnp.dot(lhs2, w2_ref[kh], preferred_element_type=f32)
    y2 = jnp.maximum(acc2 + b2_ref[...], 0.0)                 # row = oh*tb + b

    # ---- 2x2 max-pool (pool2) ------------------------------------------------
    # ow-direction: one-hot lane-shift matmul brings the odd-ow partner to the
    # even ow lane group (deterministic; avoids roll-direction ambiguity).
    y2s = jnp.dot(y2.astype(bf16), p_ref[...], preferred_element_type=f32)
    y2p = jnp.maximum(y2, y2s)                                # even ow groups = ow-pair max
    # oh-direction: aligned tb-row block maxes; concat the 4 pooled rows along
    # lanes so fc1 becomes a single wide-K dot.
    prow = []
    for qh in range(4):
        a = y2p[(2 * qh) * tb:(2 * qh + 1) * tb, :]
        c = y2p[(2 * qh + 1) * tb:(2 * qh + 2) * tb, :]
        prow.append(jnp.maximum(a, c))                        # (tb, 128), row = image
    pooled = jnp.concatenate(prow, axis=-1)                   # (tb, 512)

    # ---- fc1 + ReLU (single wide-K dot), fc2, log_softmax --------------------
    h3 = jnp.dot(pooled.astype(bf16), fw1_ref[...], preferred_element_type=f32)
    h3 = jnp.maximum(h3 + fb1_ref[...], 0.0)                  # (tb, 128)
    z = jnp.dot(h3.astype(bf16), fw2_ref[...], preferred_element_type=f32) + fb2_ref[...]
    # fb2 padding lanes are -1e30 (kept f32) so they vanish from the softmax.
    m = jnp.max(z, axis=-1, keepdims=True)
    lse = m + jnp.log(jnp.sum(jnp.exp(z - m), axis=-1, keepdims=True))
    out_ref[...] = z - lse


# ---------------------------------------------------------------------------
# Wrapper: one-time layout glue (inputs to bf16 banded/lane-dense layouts).
# ---------------------------------------------------------------------------
@jax.jit
def gennet_forward(x_nchw, params):
    (cw1, cb1), (cw2, cb2), (fw1, fb1), (fw2, fb2) = params
    f32, bf16 = jnp.float32, jnp.bfloat16
    B, CIN, H, W = x_nchw.shape
    K = 5
    C1, C2 = cw1.shape[0], cw2.shape[0]
    HID, NOUT = fw1.shape[1], fw2.shape[1]
    # Layout constants baked into the kernel (GenNet defaults).
    assert (CIN, H, W, C1, C2, K) == (1, 28, 28, 6, 16, 5)
    assert HID <= LANES and NOUT <= LANES
    PH1 = PW1 = 12            # pooled conv1 spatial
    OH2 = OW2 = 8             # conv2 spatial
    PH2 = PW2 = 4             # pooled conv2 spatial

    G = -(-B // TB)           # grid steps
    Bp = G * TB               # padded batch

    # ---- input: (dh, grid, i*TB + b, kh*28 + w), zero padded, bf16 ----------
    x2 = jnp.pad(x_nchw[:, 0].astype(f32), ((0, Bp - B), (0, 0), (0, 0)))
    slabs = jnp.stack(
        [jnp.stack([x2[:, dh + kh:dh + kh + 2 * PH1:2, :] for kh in range(K)], axis=2)
         for dh in range(2)], axis=1)                           # (Bp, 2, 12, 5, 28)
    slabs = slabs.reshape(Bp, 2, PH1, K * W)
    slabs = jnp.pad(slabs, ((0, 0), (0, 0), (0, 16 - PH1), (0, KPAD - K * W)))
    xrows = slabs.reshape(G, TB, 2, 16, KPAD).transpose(2, 0, 3, 1, 4)
    xrows = xrows.reshape(2, G, 16 * TB, KPAD).astype(bf16)

    # ---- conv1 banded weights: W1[dw, kh*28 + (2j+dw+kw), j*6 + c] = cw1 -----
    dwv, khv, kwv, jv, cv = np.meshgrid(np.arange(2), np.arange(K), np.arange(K),
                                        np.arange(PW1), np.arange(C1), indexing='ij')
    r1 = khv * W + 2 * jv + dwv + kwv
    c1 = jv * C1 + cv
    w1band = (jnp.zeros((2, KPAD, LANES), f32)
              .at[dwv, r1, c1].set(cw1.astype(f32)[cv, 0, khv, kwv]).astype(bf16))
    b1p = jnp.pad(jnp.tile(cb1.astype(f32), PW1),
                  (0, LANES - PW1 * C1)).reshape(1, LANES)

    # ---- conv2 banded weights: W2[kh, (ow+kw)*6 + ci, ow*16 + co] = cw2 ------
    khv, owv, kwv, civ, cov = np.meshgrid(np.arange(K), np.arange(OW2), np.arange(K),
                                          np.arange(C1), np.arange(C2), indexing='ij')
    r2 = (owv + kwv) * C1 + civ
    c2 = owv * C2 + cov
    w2band = (jnp.zeros((K, LANES, LANES), f32)
              .at[khv, r2, c2].set(cw2.astype(f32)[cov, civ, khv, kwv]).astype(bf16))
    b2p = jnp.tile(cb2.astype(f32), OW2).reshape(1, LANES)

    # ---- one-hot lane shift for pool2's ow direction (constant) --------------
    pshift = np.zeros((LANES, LANES), np.float32)
    for qw in range(PW2):
        for co in range(C2):
            pshift[(2 * qw + 1) * C2 + co, (2 * qw) * C2 + co] = 1.0
    pshift = jnp.asarray(pshift, bf16)

    # ---- fc1 weight, regrouped to the pooled lane layout ---------------------
    # pooled lane = qh*128 + 32*qw + co  <-  PyTorch flat index co*16 + qh*4 + qw
    cov, qhv, qwv = np.meshgrid(np.arange(C2), np.arange(PH2), np.arange(PW2),
                                indexing='ij')
    src = (cov * PH2 + qhv) * PW2 + qwv
    tgt = qhv * LANES + (2 * qwv) * C2 + cov
    fw1r = (jnp.zeros((PH2 * LANES, HID), f32)
            .at[tgt.ravel()].set(fw1.astype(f32)[src.ravel()]))
    fw1p = jnp.pad(fw1r, ((0, 0), (0, LANES - HID))).astype(bf16)
    fb1p = jnp.pad(fb1.astype(f32), (0, LANES - HID)).reshape(1, LANES)

    fw2p = jnp.zeros((LANES, LANES), f32).at[:HID, :NOUT].set(fw2.astype(f32)).astype(bf16)
    fb2p = jnp.full((1, LANES), -1e30, f32).at[0, :NOUT].set(fb2.astype(f32))

    kern = functools.partial(_gennet_kernel, tb=TB)

    m1, m2 = 16 * TB, 8 * TB
    flops_per_step = 2 * (4 * m1 * KPAD * LANES          # conv1
                          + K * m2 * LANES * LANES       # conv2
                          + m2 * LANES * LANES           # ow-pool lane shift
                          + TB * PH2 * LANES * LANES     # fc1 (wide K)
                          + TB * LANES * LANES)          # fc2
    const_bytes = sum(int(a.size) * a.dtype.itemsize for a in
                      (w1band, b1p, w2band, b2p, pshift, fw1p, fb1p, fw2p, fb2p))
    bytes_per_step = 2 * (2 * 16 * TB * KPAD) + 4 * TB * LANES

    out = pl.pallas_call(
        kern,
        out_shape=jax.ShapeDtypeStruct((Bp, LANES), f32),
        grid=(G,),
        in_specs=[
            pl.BlockSpec((2, 1, 16 * TB, KPAD), lambda g: (0, g, 0, 0)),  # images
            pl.BlockSpec((2, KPAD, LANES), lambda g: (0, 0, 0)),          # conv1 W
            pl.BlockSpec((1, LANES), lambda g: (0, 0)),                   # conv1 b
            pl.BlockSpec((K, LANES, LANES), lambda g: (0, 0, 0)),         # conv2 W
            pl.BlockSpec((1, LANES), lambda g: (0, 0)),                   # conv2 b
            pl.BlockSpec((LANES, LANES), lambda g: (0, 0)),               # ow-shift
            pl.BlockSpec((PH2 * LANES, LANES), lambda g: (0, 0)),         # fc1 W
            pl.BlockSpec((1, LANES), lambda g: (0, 0)),                   # fc1 b
            pl.BlockSpec((LANES, LANES), lambda g: (0, 0)),               # fc2 W
            pl.BlockSpec((1, LANES), lambda g: (0, 0)),                   # fc2 b
        ],
        out_specs=pl.BlockSpec((TB, LANES), lambda g: (g, 0)),
        compiler_params=pltpu.CompilerParams(
            dimension_semantics=("parallel",)),
        cost_estimate=pl.CostEstimate(flops=G * flops_per_step,
                                      transcendentals=Bp * (LANES + 1),
                                      bytes_accessed=G * bytes_per_step + const_bytes),
    )(xrows, w1band, b1p, w2band, b2p, pshift, fw1p, fb1p, fw2p, fb2p)

    return out[:B, :NOUT]


# ---------------------------------------------------------------------------
# Pure-JAX reference of the PyTorch forward (for verification)
# ---------------------------------------------------------------------------
def gennet_reference(x, params):
    (cw1, cb1), (cw2, cb2), (fw1, fb1), (fw2, fb2) = params
    dn = ('NCHW', 'OIHW', 'NCHW')
    hi = lax.Precision.HIGHEST

    y = lax.conv_general_dilated(x, cw1, (1, 1), 'VALID',
                                 dimension_numbers=dn, precision=hi)
    y = jax.nn.relu(y + cb1[None, :, None, None])
    y = lax.reduce_window(y, -jnp.inf, lax.max, (1, 1, 2, 2), (1, 1, 2, 2), 'VALID')

    y = lax.conv_general_dilated(y, cw2, (1, 1), 'VALID',
                                 dimension_numbers=dn, precision=hi)
    y = jax.nn.relu(y + cb2[None, :, None, None])
    y = lax.reduce_window(y, -jnp.inf, lax.max, (1, 1, 2, 2), (1, 1, 2, 2), 'VALID')

    flat = y.reshape(y.shape[0], -1)
    h = jax.nn.relu(jnp.dot(flat, fw1, precision=hi) + fb1)
    z = jnp.dot(h, fw2, precision=hi) + fb2
    return jax.nn.log_softmax(z, axis=1)


# ---------------------------------------------------------------------------
if __name__ == "__main__":
    B, CIN, DIM, NOUT = 2, 1, 28, 10          # GenNet defaults
    dim1 = (DIM - 4) // 2                     # after conv1 + pool
    fcdim = (dim1 - 4) // 2                   # after conv2 + pool
    fc_in = fcdim * fcdim * 16                # 4 * 4 * 16 = 256

    key = jax.random.PRNGKey(0)
    ks = jax.random.split(key, 9)
    x = jax.random.normal(ks[0], (B, CIN, DIM, DIM), jnp.float32)

    # Deterministic synthetic parameters (PyTorch shapes; fc weights stored
    # pre-transposed as (in, out), i.e. nn.Linear.weight.T).
    cw1 = jax.random.normal(ks[1], (6, CIN, 5, 5), jnp.float32) * 0.2
    cb1 = jax.random.normal(ks[2], (6,), jnp.float32) * 0.1
    cw2 = jax.random.normal(ks[3], (16, 6, 5, 5), jnp.float32) * 0.1
    cb2 = jax.random.normal(ks[4], (16,), jnp.float32) * 0.1
    fw1 = jax.random.normal(ks[5], (fc_in, 84), jnp.float32) * 0.05
    fb1 = jax.random.normal(ks[6], (84,), jnp.float32) * 0.1
    fw2 = jax.random.normal(ks[7], (84, NOUT), jnp.float32) * 0.1
    fb2 = jax.random.normal(ks[8], (NOUT,), jnp.float32) * 0.1

    params = ((cw1, cb1), (cw2, cb2), (fw1, fb1), (fw2, fb2))

    out = jax.block_until_ready(gennet_forward(x, params))
    ref = jax.block_until_ready(gennet_reference(x, params))

    assert out.shape == (B, NOUT), out.shape
    # bf16 matmul operands with f32 accumulation -> slightly looser tolerance.
    if not bool(jnp.allclose(out, ref, atol=5e-2, rtol=5e-2)):
        max_err = float(jnp.max(jnp.abs(out - ref)))
        raise AssertionError(f"Pallas output mismatch, max abs err = {max_err}")

    print("KERNEL_OK")
</pallas_src>

<mosaic_0001>
module attributes {stable_mosaic.version = 11 : i64} {
  func.func @_gennet_kernel(%arg0: i32, %arg1: memref<2x1x128x256xbf16, #tpu.memory_space<vmem>>, %arg2: memref<2x256x128xbf16, #tpu.memory_space<vmem>>, %arg3: memref<1x128xf32, #tpu.memory_space<vmem>>, %arg4: memref<5x128x128xbf16, #tpu.memory_space<vmem>>, %arg5: memref<1x128xf32, #tpu.memory_space<vmem>>, %arg6: memref<128x128xbf16, #tpu.memory_space<vmem>>, %arg7: memref<512x128xbf16, #tpu.memory_space<vmem>>, %arg8: memref<1x128xf32, #tpu.memory_space<vmem>>, %arg9: memref<128x128xbf16, #tpu.memory_space<vmem>>, %arg10: memref<1x128xf32, #tpu.memory_space<vmem>>, %arg11: memref<8x128xf32, #tpu.memory_space<vmem>>) attributes {dimension_semantics = [#tpu.dimension_semantics<parallel>], iteration_bounds = array<i64: 1>, scalar_prefetch = 0 : i64, scratch_operands = 0 : i64, tpu.core_type = #tpu.core_type<tc>, window_params = [{transform_indices = @transform_0, window_bounds = array<i64: 2, 1, 128, 256>}, {pipeline_mode = #tpu.pipeline_mode<synchronous>, transform_indices = @transform_1, window_bounds = array<i64: 2, 256, 128>}, {pipeline_mode = #tpu.pipeline_mode<synchronous>, transform_indices = @transform_2, window_bounds = array<i64: 1, 128>}, {pipeline_mode = #tpu.pipeline_mode<synchronous>, transform_indices = @transform_3, window_bounds = array<i64: 5, 128, 128>}, {pipeline_mode = #tpu.pipeline_mode<synchronous>, transform_indices = @transform_4, window_bounds = array<i64: 1, 128>}, {pipeline_mode = #tpu.pipeline_mode<synchronous>, transform_indices = @transform_5, window_bounds = array<i64: 128, 128>}, {pipeline_mode = #tpu.pipeline_mode<synchronous>, transform_indices = @transform_6, window_bounds = array<i64: 512, 128>}, {pipeline_mode = #tpu.pipeline_mode<synchronous>, transform_indices = @transform_7, window_bounds = array<i64: 1, 128>}, {pipeline_mode = #tpu.pipeline_mode<synchronous>, transform_indices = @transform_8, window_bounds = array<i64: 128, 128>}, {pipeline_mode = #tpu.pipeline_mode<synchronous>, transform_indices = @transform_9, window_bounds = array<i64: 1, 128>}, {transform_indices = @transform_10, window_bounds = array<i64: 8, 128>}]} {
    %c0 = arith.constant 0 : index
    %c0_0 = arith.constant 0 : index
    %c0_1 = arith.constant 0 : index
    %c0_2 = arith.constant 0 : index
    %0 = vector.load %arg1[%c0, %c0_0, %c0_1, %c0_2] : memref<2x1x128x256xbf16, #tpu.memory_space<vmem>>, vector<1x1x128x256xbf16>
    %1 = vector.shape_cast %0 : vector<1x1x128x256xbf16> to vector<128x256xbf16>
    %c0_3 = arith.constant 0 : index
    %c0_4 = arith.constant 0 : index
    %c0_5 = arith.constant 0 : index
    %2 = vector.load %arg2[%c0_3, %c0_4, %c0_5] : memref<2x256x128xbf16, #tpu.memory_space<vmem>>, vector<1x256x128xbf16>
    %3 = vector.shape_cast %2 : vector<1x256x128xbf16> to vector<256x128xbf16>
    %cst = arith.constant dense<0.000000e+00> : vector<128x128xf32>
    %4 = tpu.matmul %1, %3, %cst {dimension_numbers = #tpu.dot_dimension_numbers<[1], [0], [0], [1], [0, 0, 1, 1], [], []>} : vector<128x256xbf16>, vector<256x128xbf16>, vector<128x128xf32> -> vector<128x128xf32>
    %c1 = arith.constant 1 : index
    %c0_6 = arith.constant 0 : index
    %c0_7 = arith.constant 0 : index
    %5 = vector.load %arg2[%c1, %c0_6, %c0_7] : memref<2x256x128xbf16, #tpu.memory_space<vmem>>, vector<1x256x128xbf16>
    %6 = vector.shape_cast %5 : vector<1x256x128xbf16> to vector<256x128xbf16>
    %cst_8 = arith.constant dense<0.000000e+00> : vector<128x128xf32>
    %7 = tpu.matmul %1, %6, %cst_8 {dimension_numbers = #tpu.dot_dimension_numbers<[1], [0], [0], [1], [0, 0, 1, 1], [], []>} : vector<128x256xbf16>, vector<256x128xbf16>, vector<128x128xf32> -> vector<128x128xf32>
    %8 = arith.maximumf %4, %7 : vector<128x128xf32>
    %c1_9 = arith.constant 1 : index
    %c0_10 = arith.constant 0 : index
    %c0_11 = arith.constant 0 : index
    %c0_12 = arith.constant 0 : index
    %9 = vector.load %arg1[%c1_9, %c0_10, %c0_11, %c0_12] : memref<2x1x128x256xbf16, #tpu.memory_space<vmem>>, vector<1x1x128x256xbf16>
    %10 = vector.shape_cast %9 : vector<1x1x128x256xbf16> to vector<128x256xbf16>
    %c0_13 = arith.constant 0 : index
    %c0_14 = arith.constant 0 : index
    %c0_15 = arith.constant 0 : index
    %11 = vector.load %arg2[%c0_13, %c0_14, %c0_15] : memref<2x256x128xbf16, #tpu.memory_space<vmem>>, vector<1x256x128xbf16>
    %12 = vector.shape_cast %11 : vector<1x256x128xbf16> to vector<256x128xbf16>
    %cst_16 = arith.constant dense<0.000000e+00> : vector<128x128xf32>
    %13 = tpu.matmul %10, %12, %cst_16 {dimension_numbers = #tpu.dot_dimension_numbers<[1], [0], [0], [1], [0, 0, 1, 1], [], []>} : vector<128x256xbf16>, vector<256x128xbf16>, vector<128x128xf32> -> vector<128x128xf32>
    %14 = arith.maximumf %8, %13 : vector<128x128xf32>
    %c1_17 = arith.constant 1 : index
    %c0_18 = arith.constant 0 : index
    %c0_19 = arith.constant 0 : index
    %15 = vector.load %arg2[%c1_17, %c0_18, %c0_19] : memref<2x256x128xbf16, #tpu.memory_space<vmem>>, vector<1x256x128xbf16>
    %16 = vector.shape_cast %15 : vector<1x256x128xbf16> to vector<256x128xbf16>
    %cst_20 = arith.constant dense<0.000000e+00> : vector<128x128xf32>
    %17 = tpu.matmul %10, %16, %cst_20 {dimension_numbers = #tpu.dot_dimension_numbers<[1], [0], [0], [1], [0, 0, 1, 1], [], []>} : vector<128x256xbf16>, vector<256x128xbf16>, vector<128x128xf32> -> vector<128x128xf32>
    %18 = arith.maximumf %14, %17 : vector<128x128xf32>
    %c0_21 = arith.constant 0 : index
    %c0_22 = arith.constant 0 : index
    %19 = vector.load %arg3[%c0_21, %c0_22] : memref<1x128xf32, #tpu.memory_space<vmem>>, vector<1x128xf32>
    %20 = vector.broadcast %19 : vector<1x128xf32> to vector<128x128xf32>
    %21 = arith.addf %18, %20 : vector<128x128xf32>
    %cst_23 = arith.constant 0.000000e+00 : f32
    %22 = vector.broadcast %cst_23 : f32 to vector<128x128xf32>
    %23 = arith.maximumf %21, %22 : vector<128x128xf32>
    %cst_24 = arith.constant 0.000000e+00 : f32
    %24 = vector.broadcast %cst_24 : f32 to vector<64x128xf32>
    %25 = vector.extract_strided_slice %23 {offsets = [0, 0], sizes = [64, 128], strides = [1, 1]} : vector<128x128xf32> to vector<64x128xf32>
    %26 = arith.truncf %25 : vector<64x128xf32> to vector<64x128xbf16>
    %c0_25 = arith.constant 0 : index
    %c0_26 = arith.constant 0 : index
    %c0_27 = arith.constant 0 : index
    %27 = vector.load %arg4[%c0_25, %c0_26, %c0_27] : memref<5x128x128xbf16, #tpu.memory_space<vmem>>, vector<1x128x128xbf16>
    %28 = vector.shape_cast %27 : vector<1x128x128xbf16> to vector<128x128xbf16>
    %cst_28 = arith.constant dense<0.000000e+00> : vector<64x128xf32>
    %29 = tpu.matmul %26, %28, %cst_28 {dimension_numbers = #tpu.dot_dimension_numbers<[1], [0], [0], [1], [0, 0, 1, 1], [], []>} : vector<64x128xbf16>, vector<128x128xbf16>, vector<64x128xf32> -> vector<64x128xf32>
    %30 = arith.addf %24, %29 : vector<64x128xf32>
    %31 = vector.extract_strided_slice %23 {offsets = [8, 0], sizes = [64, 128], strides = [1, 1]} : vector<128x128xf32> to vector<64x128xf32>
    %32 = arith.truncf %31 : vector<64x128xf32> to vector<64x128xbf16>
    %c1_29 = arith.constant 1 : index
    %c0_30 = arith.constant 0 : index
    %c0_31 = arith.constant 0 : index
    %33 = vector.load %arg4[%c1_29, %c0_30, %c0_31] : memref<5x128x128xbf16, #tpu.memory_space<vmem>>, vector<1x128x128xbf16>
    %34 = vector.shape_cast %33 : vector<1x128x128xbf16> to vector<128x128xbf16>
    %cst_32 = arith.constant dense<0.000000e+00> : vector<64x128xf32>
    %35 = tpu.matmul %32, %34, %cst_32 {dimension_numbers = #tpu.dot_dimension_numbers<[1], [0], [0], [1], [0, 0, 1, 1], [], []>} : vector<64x128xbf16>, vector<128x128xbf16>, vector<64x128xf32> -> vector<64x128xf32>
    %36 = arith.addf %30, %35 : vector<64x128xf32>
    %37 = vector.extract_strided_slice %23 {offsets = [16, 0], sizes = [64, 128], strides = [1, 1]} : vector<128x128xf32> to vector<64x128xf32>
    %38 = arith.truncf %37 : vector<64x128xf32> to vector<64x128xbf16>
    %c2 = arith.constant 2 : index
    %c0_33 = arith.constant 0 : index
    %c0_34 = arith.constant 0 : index
    %39 = vector.load %arg4[%c2, %c0_33, %c0_34] : memref<5x128x128xbf16, #tpu.memory_space<vmem>>, vector<1x128x128xbf16>
    %40 = vector.shape_cast %39 : vector<1x128x128xbf16> to vector<128x128xbf16>
    %cst_35 = arith.constant dense<0.000000e+00> : vector<64x128xf32>
    %41 = tpu.matmul %38, %40, %cst_35 {dimension_numbers = #tpu.dot_dimension_numbers<[1], [0], [0], [1], [0, 0, 1, 1], [], []>} : vector<64x128xbf16>, vector<128x128xbf16>, vector<64x128xf32> -> vector<64x128xf32>
    %42 = arith.addf %36, %41 : vector<64x128xf32>
    %43 = vector.extract_strided_slice %23 {offsets = [24, 0], sizes = [64, 128], strides = [1, 1]} : vector<128x128xf32> to vector<64x128xf32>
    %44 = arith.truncf %43 : vector<64x128xf32> to vector<64x128xbf16>
    %c3 = arith.constant 3 : index
    %c0_36 = arith.constant 0 : index
    %c0_37 = arith.constant 0 : index
    %45 = vector.load %arg4[%c3, %c0_36, %c0_37] : memref<5x128x128xbf16, #tpu.memory_space<vmem>>, vector<1x128x128xbf16>
    %46 = vector.shape_cast %45 : vector<1x128x128xbf16> to vector<128x128xbf16>
    %cst_38 = arith.constant dense<0.000000e+00> : vector<64x128xf32>
    %47 = tpu.matmul %44, %46, %cst_38 {dimension_numbers = #tpu.dot_dimension_numbers<[1], [0], [0], [1], [0, 0, 1, 1], [], []>} : vector<64x128xbf16>, vector<128x128xbf16>, vector<64x128xf32> -> vector<64x128xf32>
    %48 = arith.addf %42, %47 : vector<64x128xf32>
    %49 = vector.extract_strided_slice %23 {offsets = [32, 0], sizes = [64, 128], strides = [1, 1]} : vector<128x128xf32> to vector<64x128xf32>
    %50 = arith.truncf %49 : vector<64x128xf32> to vector<64x128xbf16>
    %c4 = arith.constant 4 : index
    %c0_39 = arith.constant 0 : index
    %c0_40 = arith.constant 0 : index
    %51 = vector.load %arg4[%c4, %c0_39, %c0_40] : memref<5x128x128xbf16, #tpu.memory_space<vmem>>, vector<1x128x128xbf16>
    %52 = vector.shape_cast %51 : vector<1x128x128xbf16> to vector<128x128xbf16>
    %cst_41 = arith.constant dense<0.000000e+00> : vector<64x128xf32>
    %53 = tpu.matmul %50, %52, %cst_41 {dimension_numbers = #tpu.dot_dimension_numbers<[1], [0], [0], [1], [0, 0, 1, 1], [], []>} : vector<64x128xbf16>, vector<128x128xbf16>, vector<64x128xf32> -> vector<64x128xf32>
    %54 = arith.addf %48, %53 : vector<64x128xf32>
    %c0_42 = arith.constant 0 : index
    %c0_43 = arith.constant 0 : index
    %55 = vector.load %arg5[%c0_42, %c0_43] : memref<1x128xf32, #tpu.memory_space<vmem>>, vector<1x128xf32>
    %56 = vector.broadcast %55 : vector<1x128xf32> to vector<64x128xf32>
    %57 = arith.addf %54, %56 : vector<64x128xf32>
    %cst_44 = arith.constant 0.000000e+00 : f32
    %58 = vector.broadcast %cst_44 : f32 to vector<64x128xf32>
    %59 = arith.maximumf %57, %58 : vector<64x128xf32>
    %60 = arith.truncf %59 : vector<64x128xf32> to vector<64x128xbf16>
    %c0_45 = arith.constant 0 : index
    %c0_46 = arith.constant 0 : index
    %61 = vector.load %arg6[%c0_45, %c0_46] : memref<128x128xbf16, #tpu.memory_space<vmem>>, vector<128x128xbf16>
    %cst_47 = arith.constant dense<0.000000e+00> : vector<64x128xf32>
    %62 = tpu.matmul %60, %61, %cst_47 {dimension_numbers = #tpu.dot_dimension_numbers<[1], [0], [0], [1], [0, 0, 1, 1], [], []>} : vector<64x128xbf16>, vector<128x128xbf16>, vector<64x128xf32> -> vector<64x128xf32>
    %63 = arith.maximumf %59, %62 : vector<64x128xf32>
    %64 = vector.extract_strided_slice %63 {offsets = [0, 0], sizes = [8, 128], strides = [1, 1]} : vector<64x128xf32> to vector<8x128xf32>
    %65 = vector.extract_strided_slice %63 {offsets = [8, 0], sizes = [8, 128], strides = [1, 1]} : vector<64x128xf32> to vector<8x128xf32>
    %66 = arith.maximumf %64, %65 : vector<8x128xf32>
    %67 = vector.extract_strided_slice %63 {offsets = [16, 0], sizes = [8, 128], strides = [1, 1]} : vector<64x128xf32> to vector<8x128xf32>
    %68 = vector.extract_strided_slice %63 {offsets = [24, 0], sizes = [8, 128], strides = [1, 1]} : vector<64x128xf32> to vector<8x128xf32>
    %69 = arith.maximumf %67, %68 : vector<8x128xf32>
    %70 = vector.extract_strided_slice %63 {offsets = [32, 0], sizes = [8, 128], strides = [1, 1]} : vector<64x128xf32> to vector<8x128xf32>
    %71 = vector.extract_strided_slice %63 {offsets = [40, 0], sizes = [8, 128], strides = [1, 1]} : vector<64x128xf32> to vector<8x128xf32>
    %72 = arith.maximumf %70, %71 : vector<8x128xf32>
    %73 = vector.extract_strided_slice %63 {offsets = [48, 0], sizes = [8, 128], strides = [1, 1]} : vector<64x128xf32> to vector<8x128xf32>
    %74 = vector.extract_strided_slice %63 {offsets = [56, 0], sizes = [8, 128], strides = [1, 1]} : vector<64x128xf32> to vector<8x128xf32>
    %75 = arith.maximumf %73, %74 : vector<8x128xf32>
    %76 = tpu.concatenate %66, %69, %72, %75 in 1 : vector<8x128xf32>, vector<8x128xf32>, vector<8x128xf32>, vector<8x128xf32> -> vector<8x512xf32>
    %77 = arith.truncf %76 : vector<8x512xf32> to vector<8x512xbf16>
    %c0_48 = arith.constant 0 : index
    %c0_49 = arith.constant 0 : index
    %78 = vector.load %arg7[%c0_48, %c0_49] : memref<512x128xbf16, #tpu.memory_space<vmem>>, vector<512x128xbf16>
    %cst_50 = arith.constant dense<0.000000e+00> : vector<8x128xf32>
    %79 = tpu.matmul %77, %78, %cst_50 {dimension_numbers = #tpu.dot_dimension_numbers<[1], [0], [0], [1], [0, 0, 1, 1], [], []>} : vector<8x512xbf16>, vector<512x128xbf16>, vector<8x128xf32> -> vector<8x128xf32>
    %c0_51 = arith.constant 0 : index
    %c0_52 = arith.constant 0 : index
    %80 = vector.load %arg8[%c0_51, %c0_52] : memref<1x128xf32, #tpu.memory_space<vmem>>, vector<1x128xf32>
    %81 = vector.broadcast %80 : vector<1x128xf32> to vector<8x128xf32>
    %82 = arith.addf %79, %81 : vector<8x128xf32>
    %cst_53 = arith.constant 0.000000e+00 : f32
    %83 = vector.broadcast %cst_53 : f32 to vector<8x128xf32>
    %84 = arith.maximumf %82, %83 : vector<8x128xf32>
    %85 = arith.truncf %84 : vector<8x128xf32> to vector<8x128xbf16>
    %c0_54 = arith.constant 0 : index
    %c0_55 = arith.constant 0 : index
    %86 = vector.load %arg9[%c0_54, %c0_55] : memref<128x128xbf16, #tpu.memory_space<vmem>>, vector<128x128xbf16>
    %cst_56 = arith.constant dense<0.000000e+00> : vector<8x128xf32>
    %87 = tpu.matmul %85, %86, %cst_56 {dimension_numbers = #tpu.dot_dimension_numbers<[1], [0], [0], [1], [0, 0, 1, 1], [], []>} : vector<8x128xbf16>, vector<128x128xbf16>, vector<8x128xf32> -> vector<8x128xf32>
    %c0_57 = arith.constant 0 : index
    %c0_58 = arith.constant 0 : index
    %88 = vector.load %arg10[%c0_57, %c0_58] : memref<1x128xf32, #tpu.memory_space<vmem>>, vector<1x128xf32>
    %89 = vector.broadcast %88 : vector<1x128xf32> to vector<8x128xf32>
    %90 = arith.addf %87, %89 : vector<8x128xf32>
    %cst_59 = arith.constant dense<0xFF800000> : vector<8xf32>
    %91 = vector.multi_reduction <maximumf>, %90, %cst_59 [1] : vector<8x128xf32> to vector<8xf32>
    %92 = vector.shape_cast %91 : vector<8xf32> to vector<8x1xf32>
    %93 = vector.broadcast %92 : vector<8x1xf32> to vector<8x128xf32>
    %94 = arith.subf %90, %93 : vector<8x128xf32>
    %95 = math.exp %94 : vector<8x128xf32>
    %cst_60 = arith.constant dense<0.000000e+00> : vector<8xf32>
    %96 = vector.multi_reduction <add>, %95, %cst_60 [1] : vector<8x128xf32> to vector<8xf32>
    %97 = vector.shape_cast %96 : vector<8xf32> to vector<8x1xf32>
    %98 = math.log %97 : vector<8x1xf32>
    %99 = arith.addf %92, %98 : vector<8x1xf32>
    %100 = vector.broadcast %99 : vector<8x1xf32> to vector<8x128xf32>
    %101 = arith.subf %90, %100 : vector<8x128xf32>
    %c0_61 = arith.constant 0 : index
    %c0_62 = arith.constant 0 : index
    %102 = vector.load %arg11[%c0_61, %c0_62] : memref<8x128xf32, #tpu.memory_space<vmem>>, vector<8x128xf32>
    tpu.vector_store %arg11[%c0_61, %c0_62], %101 {strides = array<i32>} : memref<8x128xf32, #tpu.memory_space<vmem>>, vector<8x128xf32>,
    return
  }
  func.func @transform_0(%arg0: i32) -> (i32, i32, i32, i32) {
    %c0_i32 = arith.constant 0 : i32
    %c0_i32_0 = arith.constant 0 : i32
    %c0_i32_1 = arith.constant 0 : i32
    %c0_i32_2 = arith.constant 0 : i32
    return %c0_i32, %arg0, %c0_i32_0, %c0_i32_1 : i32, i32, i32, i32
  }
  func.func @transform_1(%arg0: i32) -> (i32, i32, i32) {
    %c0_i32 = arith.constant 0 : i32
    %c0_i32_0 = arith.constant 0 : i32
    %c0_i32_1 = arith.constant 0 : i32
    %c0_i32_2 = arith.constant 0 : i32
    return %c0_i32, %c0_i32_0, %c0_i32_1 : i32, i32, i32
  }
  func.func @transform_2(%arg0: i32) -> (i32, i32) {
    %c0_i32 = arith.constant 0 : i32
    %c0_i32_0 = arith.constant 0 : i32
    %c0_i32_1 = arith.constant 0 : i32
    return %c0_i32, %c0_i32_0 : i32, i32
  }
  func.func @transform_3(%arg0: i32) -> (i32, i32, i32) {
    %c0_i32 = arith.constant 0 : i32
    %c0_i32_0 = arith.constant 0 : i32
    %c0_i32_1 = arith.constant 0 : i32
    %c0_i32_2 = arith.constant 0 : i32
    return %c0_i32, %c0_i32_0, %c0_i32_1 : i32, i32, i32
  }
  func.func @transform_4(%arg0: i32) -> (i32, i32) {
    %c0_i32 = arith.constant 0 : i32
    %c0_i32_0 = arith.constant 0 : i32
    %c0_i32_1 = arith.constant 0 : i32
    return %c0_i32, %c0_i32_0 : i32, i32
  }
  func.func @transform_5(%arg0: i32) -> (i32, i32) {
    %c0_i32 = arith.constant 0 : i32
    %c0_i32_0 = arith.constant 0 : i32
    %c0_i32_1 = arith.constant 0 : i32
    return %c0_i32, %c0_i32_0 : i32, i32
  }
  func.func @transform_6(%arg0: i32) -> (i32, i32) {
    %c0_i32 = arith.constant 0 : i32
    %c0_i32_0 = arith.constant 0 : i32
    %c0_i32_1 = arith.constant 0 : i32
    return %c0_i32, %c0_i32_0 : i32, i32
  }
  func.func @transform_7(%arg0: i32) -> (i32, i32) {
    %c0_i32 = arith.constant 0 : i32
    %c0_i32_0 = arith.constant 0 : i32
    %c0_i32_1 = arith.constant 0 : i32
    return %c0_i32, %c0_i32_0 : i32, i32
  }
  func.func @transform_8(%arg0: i32) -> (i32, i32) {
    %c0_i32 = arith.constant 0 : i32
    %c0_i32_0 = arith.constant 0 : i32
    %c0_i32_1 = arith.constant 0 : i32
    return %c0_i32, %c0_i32_0 : i32, i32
  }
  func.func @transform_9(%arg0: i32) -> (i32, i32) {
    %c0_i32 = arith.constant 0 : i32
    %c0_i32_0 = arith.constant 0 : i32
    %c0_i32_1 = arith.constant 0 : i32
    return %c0_i32, %c0_i32_0 : i32, i32
  }
  func.func @transform_10(%arg0: i32) -> (i32, i32) {
    %c0_i32 = arith.constant 0 : i32
    %c0_i32_0 = arith.constant 0 : i32
    return %arg0, %c0_i32 : i32, i32
  }
}

</mosaic_0001>

<bundles_post_ra>
// kernel: tile.13
= control target key start
LH: loop header
LB: loop body
LE: loop exit
PB: predicated region body
PF: predicated region fallthrough
CT: control target
= control target key end

     0   :  { %s28_s0 = inlined_call_operand.vmem [shape: f32[6], index: 0, kind: input, shape index: {}]   ;;  %s29_s1 = inlined_call_operand.vmem [shape: f32[12,6], index: 1, kind: output, shape index: {}]  }
   0x1   :  { %v4_v0 = vld [vmem:[%s28_s0] ss:$0 sm:$0xff] }
   0x2   :  { %5 = vst [vmem:[%s29_s1] sm:$0xff] %v4_v0  ;;  %8 = vst [vmem:[%s29_s1 + $0x8] sm:$0xff] %v4_v0 }

// kernel: tile.14
= control target key start
LH: loop header
LB: loop body
LE: loop exit
PB: predicated region body
PF: predicated region fallthrough
CT: control target
= control target key end

     0   :  { %s99_s10 = smov 66   ;;  %s100_s11 = smov 54   ;;  %vm3_vm0 = vcmask 48128   ;;  %vm9_vm1 = vcmask 589328   ;;  %vm15_vm2 = vcmask 540128   ;;  %vm21_vm3 = vcmask 490928   ;;  %s159_s0 = inlined_call_operand.vmem [shape: f32[12,6], index: 0, kind: input, shape index: {}]   ;;  %s160_s1 = inlined_call_operand.vmem [shape: f32[72], index: 1, kind: output, shape index: {}]  }
   0x1   :  { %v77_v0 = vld [vmem:[%s159_s0 + $0xb] sm:$0x1]   ;;  %v79_v1 = vld [vmem:[%s159_s0 + $0x9] sm:$0x1]   ;;  %v78_v2 = vld [vmem:[%s159_s0 + $0xa] sm:$0x1]  }
   0x2   :  { %7 = vrot.lane.b32.xlu0 %v77_v0, %s99_s10  ;;  %19 = vrot.lane.b32.xlu1 %v79_v1, %s100_s11  ;;  %v80_v3 = vld [vmem:[%s159_s0 + $0x8] sm:$0x1]   ;;  %s101_s16 = smov 60   ;;  %s102_s17 = smov 48   ;;  %v81_v4 = vld [vmem:[%s159_s0 + $0x7] sm:$0x1]  }
   0x3   :  { %v2_v5 = vld [vmem:[%s159_s0] sm:$0x1]   ;;  %v82_v6 = vld [vmem:[%s159_s0 + $0x6] sm:$0x1]   ;;  %s103_s24 = smov 42   ;;  %s104_s25 = smov 36  }
   0x4   :  { %4 = vst.msk [vmem:[#allocation0] sm:$0x1] %vm3_vm0, %v2_v5   ;;  %v83_v7 = vld [vmem:[%s159_s0 + $0x5] sm:$0x1]   ;;  %v84_v8 = vld [vmem:[%s159_s0 + $0x4] sm:$0x1]  }
   0x5   :  { %s105_s30 = smov 30   ;;  %s106_s2 = smov 24   ;;  %v85_v9 = vld [vmem:[%s159_s0 + $0x3] sm:$0x1]   ;;  %v86_v10 = vld [vmem:[%s159_s0 + $0x2] sm:$0x1]  }
   0x6   :  { %13 = vrot.lane.b32.xlu0 %v78_v2, %s101_s16  ;;  %25 = vrot.lane.b32.xlu1 %v80_v3, %s102_s17  ;;  %s107_s7 = smov 18   ;;  %s108_s8 = smov 12   ;;  %v87_v11 = vld [vmem:[%s159_s0 + $0x1] sm:$0x1]   ;;  %vm27_vm4 = vcmask 441728   ;;  %vm33_vm5 = vcmask 392528  }
   0x7   :  { %s109_s0 = smov 6   ;;  %vm39_vm6 = vcmask 343328   ;;  %vm45_vm7 = vcmask 294128   ;;  %vm51_vm8 = vcmask 244928   ;;  %vm57_vm9 = vcmask 195728  }
   0x8   :  { %vm63_vm10 = vcmask 146528   ;;  %vm69_vm11 = vcmask 97328  }
   0xa   :  { %31 = vrot.lane.b32.xlu0 %v81_v4, %s103_s24  ;;  %37 = vrot.lane.b32.xlu1 %v82_v6, %s104_s25 }
   0xe   :  { %43 = vrot.lane.b32.xlu0 %v83_v7, %s105_s30  ;;  %49 = vrot.lane.b32.xlu1 %v84_v8, %s106_s2 }
  0x12   :  { %55 = vrot.lane.b32.xlu0 %v85_v9, %s107_s7  ;;  %61 = vrot.lane.b32.xlu1 %v86_v10, %s108_s8 }
  0x16   :  { %67 = vrot.lane.b32.xlu0 %v87_v11, %s109_s0 }
  0x74   :  { %v8_v12 = vpop.permute.xlu0 %7   ;;  %v20_v13 = vpop.permute.xlu1 %19  }
  0x75   :  { %10 = vst.msk [vmem:[#allocation0] sm:$0x1] %vm9_vm1, %v8_v12  }
  0x78   :  { %v14_v14 = vpop.permute.xlu0 %13   ;;  %v26_v15 = vpop.permute.xlu1 %25  }
  0x79   :  { %16 = vst.msk [vmem:[#allocation0] sm:$0x1] %vm15_vm2, %v14_v14  }
  0x7a   :  { %22 = vst.msk [vmem:[#allocation0] sm:$0x1] %vm21_vm3, %v20_v13  }
  0x7b   :  { %28 = vst.msk [vmem:[#allocation0] sm:$0x1] %vm27_vm4, %v26_v15  }
  0x7c   :  { %v32_v16 = vpop.permute.xlu0 %31   ;;  %v38_v17 = vpop.permute.xlu1 %37  }
  0x7d   :  { %34 = vst.msk [vmem:[#allocation0] sm:$0x1] %vm33_vm5, %v32_v16  }
  0x7e   :  { %40 = vst.msk [vmem:[#allocation0] sm:$0x1] %vm39_vm6, %v38_v17  }
  0x80   :  { %v44_v18 = vpop.permute.xlu0 %43   ;;  %v50_v19 = vpop.permute.xlu1 %49  }
  0x81   :  { %46 = vst.msk [vmem:[#allocation0] sm:$0x1] %vm45_vm7, %v44_v18  }
  0x82   :  { %52 = vst.msk [vmem:[#allocation0] sm:$0x1] %vm51_vm8, %v50_v19  }
  0x84   :  { %v56_v20 = vpop.permute.xlu0 %55   ;;  %v62_v21 = vpop.permute.xlu1 %61  }
  0x85   :  { %58 = vst.msk [vmem:[#allocation0] sm:$0x1] %vm57_vm9, %v56_v20  }
  0x86   :  { %64 = vst.msk [vmem:[#allocation0] sm:$0x1] %vm63_vm10, %v62_v21  }
  0x88   :  { %v68_v22 = vpop.permute.xlu0 %67  }
  0x89   :  { %70 = vst.msk [vmem:[#allocation0] sm:$0x1] %vm69_vm11, %v68_v22  }
  0x90   :  { %v74_v23 = vld [vmem:[#allocation0] sm:$0x1] }
  0x91   :  { %76 = vst [vmem:[%s160_s1] sm:$0x1] %v74_v23 }

// kernel: tile.18
= control target key start
LH: loop header
LB: loop body
LE: loop exit
PB: predicated region body
PF: predicated region fallthrough
CT: control target
= control target key end

     0   :  { %s22_s0 = inlined_call_operand.vmem [shape: f32[16], index: 0, kind: input, shape index: {}]   ;;  %s23_s1 = inlined_call_operand.vmem [shape: f32[8,16], index: 1, kind: output, shape index: {}]  }
   0x1   :  { %v4_v0 = vld [vmem:[%s22_s0] ss:$0 sm:$0xff] }
   0x2   :  { %5 = vst [vmem:[%s23_s1] sm:$0xff] %v4_v0 }

// kernel: tile.19
= control target key start
LH: loop header
LB: loop body
LE: loop exit
PB: predicated region body
PF: predicated region fallthrough
CT: control target
= control target key end

     0   :  { %s67_s10 = smov 112   ;;  %s68_s11 = smov 80   ;;  %vm3_vm0 = vcmask 130048   ;;  %vm9_vm1 = vcmask 1048448   ;;  %vm15_vm2 = vcmask 917248   ;;  %vm21_vm3 = vcmask 786048   ;;  %s111_s0 = inlined_call_operand.vmem [shape: f32[8,16], index: 0, kind: input, shape index: {}]   ;;  %s112_s1 = inlined_call_operand.vmem [shape: f32[1,128], index: 1, kind: output, shape index: {}]  }
   0x1   :  { %v53_v0 = vld [vmem:[%s111_s0 + $0x7] sm:$0x1]   ;;  %v55_v1 = vld [vmem:[%s111_s0 + $0x5] sm:$0x1]   ;;  %v54_v2 = vld [vmem:[%s111_s0 + $0x6] sm:$0x1]  }
   0x2   :  { %7 = vrot.lane.b32.xlu0 %v53_v0, %s67_s10  ;;  %19 = vrot.lane.b32.xlu1 %v55_v1, %s68_s11  ;;  %v56_v3 = vld [vmem:[%s111_s0 + $0x4] sm:$0x1]   ;;  %v2_v4 = vld [vmem:[%s111_s0] sm:$0x1]   ;;  %s69_s18 = smov 96   ;;  %s70_s19 = smov 64  }
   0x3   :  { %4 = vst.msk [vmem:[#allocation0] sm:$0x1] %vm3_vm0, %v2_v4   ;;  %v57_v5 = vld [vmem:[%s111_s0 + $0x3] sm:$0x1]   ;;  %v58_v6 = vld [vmem:[%s111_s0 + $0x2] sm:$0x1]  }
   0x4   :  { %s71_s24 = smov 48   ;;  %s72_s25 = smov 32   ;;  %v59_v7 = vld [vmem:[%s111_s0 + $0x1] sm:$0x1]   ;;  %vm27_vm4 = vcmask 654848   ;;  %vm33_vm5 = vcmask 523648  }
   0x5   :  { %s73_s0 = smov 16   ;;  %vm39_vm6 = vcmask 392448   ;;  %vm45_vm7 = vcmask 261248  }
   0x6   :  { %13 = vrot.lane.b32.xlu0 %v54_v2, %s69_s18  ;;  %25 = vrot.lane.b32.xlu1 %v56_v3, %s70_s19 }
   0xa   :  { %31 = vrot.lane.b32.xlu0 %v57_v5, %s71_s24  ;;  %37 = vrot.lane.b32.xlu1 %v58_v6, %s72_s25 }
   0xe   :  { %43 = vrot.lane.b32.xlu0 %v59_v7, %s73_s0 }
  0x74   :  { %v8_v8 = vpop.permute.xlu0 %7   ;;  %v20_v9 = vpop.permute.xlu1 %19  }
  0x75   :  { %10 = vst.msk [vmem:[#allocation0] sm:$0x1] %vm9_vm1, %v8_v8  }
  0x78   :  { %v14_v10 = vpop.permute.xlu0 %13   ;;  %v26_v11 = vpop.permute.xlu1 %25  }
  0x79   :  { %16 = vst.msk [vmem:[#allocation0] sm:$0x1] %vm15_vm2, %v14_v10  }
  0x7a   :  { %22 = vst.msk [vmem:[#allocation0] sm:$0x1] %vm21_vm3, %v20_v9  }
  0x7b   :  { %28 = vst.msk [vmem:[#allocation0] sm:$0x1] %vm27_vm4, %v26_v11  }
  0x7c   :  { %v32_v12 = vpop.permute.xlu0 %31   ;;  %v38_v13 = vpop.permute.xlu1 %37  }
  0x7d   :  { %34 = vst.msk [vmem:[#allocation0] sm:$0x1] %vm33_vm5, %v32_v12  }
  0x7e   :  { %40 = vst.msk [vmem:[#allocation0] sm:$0x1] %vm39_vm6, %v38_v13  }
  0x80   :  { %v44_v14 = vpop.permute.xlu0 %43  }
  0x81   :  { %46 = vst.msk [vmem:[#allocation0] sm:$0x1] %vm45_vm7, %v44_v14  }
  0x88   :  { %v50_v15 = vld [vmem:[#allocation0] sm:$0x1] }
  0x89   :  { %52 = vst [vmem:[%s112_s1] sm:$0x1] %v50_v15 }

// kernel: gennet_forward.1
= control target key start
LH: loop header
LB: loop body
LE: loop exit
PB: predicated region body
PF: predicated region fallthrough
CT: control target
= control target key end

     0   :  { %vm3289_vm0 = vmmov 0   ;;  %s4118_s1 = inlined_call_operand.vmem [shape: bf16[2,256,128], index: 1, kind: input, shape index: {}]   ;;  %s4119_s0 = inlined_call_operand.vmem [shape: bf16[2,1,128,256], index: 0, kind: input, shape index: {}]   ;;  %s4120_s3 = inlined_call_operand.vmem [shape: bf16[5,128,128], index: 3, kind: input, shape index: {}]   ;;  %s4121_s2 = inlined_call_operand.vmem [shape: f32[1,128], index: 2, kind: input, shape index: {}]   ;;  %s4122_s5 = inlined_call_operand.vmem [shape: bf16[128,128], index: 5, kind: input, shape index: {}]   ;;  %s4123_s6 = inlined_call_operand.vmem [shape: bf16[512,128], index: 6, kind: input, shape index: {}]   ;;  %s4124_s4 = inlined_call_operand.vmem [shape: f32[1,128], index: 4, kind: input, shape index: {}]   ;;  %s4125_s8 = inlined_call_operand.vmem [shape: bf16[128,128], index: 8, kind: input, shape index: {}]   ;;  %s4126_s7 = inlined_call_operand.vmem [shape: f32[1,128], index: 7, kind: input, shape index: {}]   ;;  %s4127_s9 = inlined_call_operand.vmem [shape: f32[1,128], index: 9, kind: input, shape index: {}]   ;;  %s4128_s10 = inlined_call_operand.vmem [shape: f32[8,128], index: 10, kind: output, shape index: {}]  }
   0x1   :  { %v3116_v0 = vld [vmem:[%s4118_s1 + $0x40] sm:$0xff]   ;;  %v3356_v2 = vld [vmem:[%s4118_s1 + $0x48] sm:$0xff]   ;;  %v3370_v4 = vld [vmem:[%s4118_s1 + $0x50] sm:$0xff]  }
   0x2   :  { %v3351_v1 = vld [vmem:[%s4118_s1] sm:$0xff]   ;;  %3066 = vmatprep.subr.bf16.mxu1 %v3116_v0  ;;  %2521 = vmatprep.subr.bf16.mxu0 %v3116_v0  ;;  %v3363_v3 = vld [vmem:[%s4118_s1 + $0x8] sm:$0xff]   ;;  %v3377_v5 = vld [vmem:[%s4118_s1 + $0x10] sm:$0xff]  }
   0x3   :  { %3074 = vmatpush3.bf16.msra.mxu1 %v3351_v1  ;;  %2522 = vmatpush3.bf16.msra.mxu0 %v3351_v1  ;;  %v3384_v6 = vld [vmem:[%s4118_s1 + $0x58] sm:$0xff]   ;;  %v3398_v8 = vld [vmem:[%s4118_s1 + $0x60] sm:$0xff]   ;;  %v3412_v10 = vld [vmem:[%s4118_s1 + $0x68] sm:$0xff]  }
   0x4   :  { %3067 = vmatprep.subr.bf16.mxu1 %v3356_v2  ;;  %2523 = vmatprep.subr.bf16.mxu0 %v3356_v2  ;;  %v3391_v7 = vld [vmem:[%s4118_s1 + $0x18] sm:$0xff]   ;;  %v3405_v9 = vld [vmem:[%s4118_s1 + $0x20] sm:$0xff]   ;;  %v3424_v12 = vld [vmem:[%s4118_s1 + $0x28] sm:$0xff]  }
   0x5   :  { %v3417_v11 = vld [vmem:[%s4119_s0 + $0x44] ss:$8 sps:$4 sm:$0xff]   ;;  %v3436_v14 = vld [vmem:[%s4118_s1 + $0x70] sm:$0xff]   ;;  %v3452_v16 = vld [vmem:[%s4118_s1 + $0x78] sm:$0xff]  }
   0x6   :  { %v3429_v13 = vld [vmem:[%s4119_s0 + $0x4] ss:$8 sps:$4 sm:$0xff]   ;;  %324 = vmatprep.mubr.bf16.mxu1 %v3417_v11  ;;  %v3445_v15 = vld [vmem:[%s4118_s1 + $0x30] sm:$0xff]   ;;  %v3459_v17 = vld [vmem:[%s4118_s1 + $0x38] sm:$0xff]  }
   0x7   :  { %3075 = vmatpush3.bf16.msra.mxu1 %v3363_v3  ;;  %2524 = vmatpush3.bf16.msra.mxu0 %v3363_v3  ;;  %v3466_v18 = vld [vmem:[%s4118_s1 + $0xc0] sm:$0xff]   ;;  %v3489_v22 = vld [vmem:[%s4118_s1 + $0xc8] sm:$0xff]   ;;  %v3494_v23 = vld [vmem:[%s4119_s0 + $0x54] ss:$8 sps:$4 sm:$0xff]  }
   0x8   :  { %3068 = vmatprep.subr.bf16.mxu1 %v3370_v4  ;;  %2525 = vmatprep.subr.bf16.mxu0 %v3370_v4  ;;  %v3471_v19 = vld [vmem:[%s4119_s0 + $0x40] ss:$8 sps:$4 sm:$0xff]   ;;  %v3499_v24 = vld [vmem:[%s4119_s0 + $0x14] ss:$8 sps:$4 sm:$0xff]   ;;  %v3521_v27 = vld [vmem:[%s4119_s0 + $0x50] ss:$8 sps:$4 sm:$0xff]  }
   0x9   :  { %292 = vmatprep.mubr.bf16.mxu0 %v3429_v13  ;;  %v3476_v20 = vld [vmem:[%s4119_s0] ss:$8 sps:$4 sm:$0xff]   ;;  %v3515_v26 = vld [vmem:[%s4118_s1 + $0xd0] sm:$0xff]   ;;  %v3541_v30 = vld [vmem:[%s4118_s1 + $0xd8] sm:$0xff]  }
   0xa   :  { %v3483_v21 = vld [vmem:[%s4118_s1 + $0x80] sm:$0xff]   ;;  %v3508_v25 = vld [vmem:[%s4118_s1 + $0x88] sm:$0xff]   ;;  %v3527_v28 = vld [vmem:[%s4119_s0 + $0x10] ss:$8 sps:$4 sm:$0xff]  }
   0xb   :  { %3076 = vmatpush3.bf16.msra.mxu1 %v3377_v5  ;;  %2526 = vmatpush3.bf16.msra.mxu0 %v3377_v5  ;;  %v3534_v29 = vld [vmem:[%s4118_s1 + $0x90] sm:$0xff]   ;;  %v3546_v31 = vld [vmem:[%s4119_s0 + $0x64] ss:$8 sps:$4 sm:$0xff]   ;;  %v3560_v33 = vld [vmem:[%s4118_s1 + $0x98] sm:$0xff]  }
   0xc   :  { %3069 = vmatprep.subr.bf16.mxu1 %v3384_v6  ;;  %2527 = vmatprep.subr.bf16.mxu0 %v3384_v6  ;;  %v3551_v32 = vld [vmem:[%s4119_s0 + $0x24] ss:$8 sps:$4 sm:$0xff]   ;;  %v3574_v35 = vld [vmem:[%s4119_s0 + $0x60] ss:$8 sps:$4 sm:$0xff]   ;;  %v3592_v39 = vld [vmem:[%s4119_s0 + $0x74] ss:$8 sps:$4 sm:$0xff]  }
   0xd   :  { %v3567_v34 = vld [vmem:[%s4118_s1 + $0xe0] sm:$0xff]   ;;  %v3160_v38 = vld [vmem:[%s4118_s1 + $0xe8] sm:$0xff]   ;;  %v3166_v40 = vld [vmem:[%s4119_s0 + $0x34] ss:$8 sps:$4 sm:$0xff]  }
   0xe   :  { %v3159_v36 = vld [vmem:[%s4119_s0 + $0x20] ss:$8 sps:$4 sm:$0xff]   ;;  %v3165_v42 = vld [vmem:[%s4118_s1 + $0xf0] sm:$0xff]   ;;  %v3170_v46 = vld [vmem:[%s4118_s1 + $0xf8] sm:$0xff]  }
   0xf   :  { %3077 = vmatpush3.bf16.msra.mxu1 %v3391_v7  ;;  %2528 = vmatpush3.bf16.msra.mxu0 %v3391_v7  ;;  %v3158_v37 = vld [vmem:[%s4118_s1 + $0xa0] sm:$0xff]   ;;  %v3161_v41 = vld [vmem:[%s4118_s1 + $0xa8] sm:$0xff]   ;;  %v3610_v43 = vld [vmem:[%s4119_s0 + $0x70] ss:$8 sps:$4 sm:$0xff]  }
  0x10   :  { %3070 = vmatprep.subr.bf16.mxu1 %v3398_v8  ;;  %2529 = vmatprep.subr.bf16.mxu0 %v3398_v8  ;;  %v3169_v44 = vld [vmem:[%s4119_s0 + $0x30] ss:$8 sps:$4 sm:$0xff]   ;;  %v3626_v47 = vld [vmem:[%s4119_s0 + $0x84] ss:$8 sps:$4 sm:$0xff]   ;;  %v3172_v49 = vld [vmem:[%s4119_s0 + $0x80] ss:$8 sps:$4 sm:$0xff]  }
  0x11   :  { %v3168_v45 = vld [vmem:[%s4118_s1 + $0xb0] sm:$0xff]   ;;  %v3171_v48 = vld [vmem:[%s4118_s1 + $0xb8] sm:$0xff]   ;;  %v3178_v52 = vld [vmem:[%s4119_s0 + $0xa4] ss:$8 sps:$4 sm:$0xff]  }
  0x12   :  { %v3175_v50 = vld [vmem:[%s4119_s0 + $0x94] ss:$8 sps:$4 sm:$0xff]   ;;  %v3177_v51 = vld [vmem:[%s4119_s0 + $0x90] ss:$8 sps:$4 sm:$0xff]   ;;  %v3180_v53 = vld [vmem:[%s4119_s0 + $0xa0] ss:$8 sps:$4 sm:$0xff]  }
  0x13   :  { %3078 = vmatpush3.bf16.msra.mxu1 %v3405_v9  ;;  %2530 = vmatpush3.bf16.msra.mxu0 %v3405_v9  ;;  %v3181_v54 = vld [vmem:[%s4119_s0 + $0xb4] ss:$8 sps:$4 sm:$0xff]   ;;  %v3183_v55 = vld [vmem:[%s4119_s0 + $0xb0] ss:$8 sps:$4 sm:$0xff]   ;;  %v3184_v56 = vld [vmem:[%s4119_s0 + $0xc4] ss:$8 sps:$4 sm:$0xff]  }
  0x14   :  { %3071 = vmatprep.subr.bf16.mxu1 %v3412_v10  ;;  %2531 = vmatprep.subr.bf16.mxu0 %v3412_v10  ;;  %v3186_v57 = vld [vmem:[%s4119_s0 + $0xc0] ss:$8 sps:$4 sm:$0xff]   ;;  %v3187_v58 = vld [vmem:[%s4119_s0 + $0xd4] ss:$8 sps:$4 sm:$0xff]   ;;  %v3189_v59 = vld [vmem:[%s4119_s0 + $0xd0] ss:$8 sps:$4 sm:$0xff]  }
  0x15   :  { %v3190_v60 = vld [vmem:[%s4120_s3 + $0x40] sm:$0xff]   ;;  %v3191_v61 = vld [vmem:[%s4120_s3 + $0x48] sm:$0xff]   ;;  %v3192_v62 = vld [vmem:[%s4120_s3 + $0x50] sm:$0xff]  }
  0x16   :  { %v3193_v63 = vld [vmem:[%s4120_s3 + $0x58] sm:$0xff]  }
  0x17   :  { %3079 = vmatpush3.bf16.msra.mxu1 %v3424_v12  ;;  %2532 = vmatpush3.bf16.msra.mxu0 %v3424_v12 }
  0x18   :  { %3072 = vmatprep.subr.bf16.mxu1 %v3436_v14  ;;  %2533 = vmatprep.subr.bf16.mxu0 %v3436_v14 }
  0x1b   :  { %3080 = vmatpush3.bf16.msra.mxu1 %v3445_v15  ;;  %2534 = vmatpush3.bf16.msra.mxu0 %v3445_v15 }
  0x1c   :  { %3073 = vmatprep.subr.bf16.mxu1 %v3452_v16  ;;  %2535 = vmatprep.subr.bf16.mxu0 %v3452_v16 }
  0x1f   :  { %3081 = vmatpush3.bf16.msra.mxu1 %v3459_v17  ;;  %2536 = vmatpush3.bf16.msra.mxu0 %v3459_v17 }
  0x20   :  { %2585 = vmatprep.subr.bf16.mxu1 %v3466_v18  ;;  %2649 = vmatprep.subr.bf16.mxu0 %v3116_v0  ;;  %v3194_v0 = vld [vmem:[%s4120_s3 + $0x60] sm:$0xff]  }
  0x22   :  { %325 = vmatmul.mubr.bf16.vlgmr.msra.gmra.mrb[0].mxu1 %v3471_v19  ;;  %293 = vmatmul.mubr.bf16.vlgmr.msra.gmra.mrb[0].mxu0 %v3476_v20 }
  0x23   :  { %2586 = vmatpush3.bf16.msra.mxu1 %v3483_v21  ;;  %2650 = vmatpush3.bf16.msra.mxu0 %v3351_v1  ;;  %v3196_v1 = vld [vmem:[%s4119_s0 + $0xe4] ss:$8 sps:$4 sm:$0xff]  }
  0x24   :  { %2587 = vmatprep.subr.bf16.mxu1 %v3489_v22  ;;  %2651 = vmatprep.subr.bf16.mxu0 %v3356_v2  ;;  %v3198_v2 = vld [vmem:[%s4119_s0 + $0xe0] ss:$8 sps:$4 sm:$0xff]  }
  0x25   :  { %332 = vmatprep.mubr.bf16.mxu1 %v3494_v23  ;;  %300 = vmatprep.mubr.bf16.mxu0 %v3499_v24 }
  0x27   :  { %2588 = vmatpush3.bf16.msra.mxu1 %v3508_v25  ;;  %2652 = vmatpush3.bf16.msra.mxu0 %v3363_v3  ;;  %v3195_v3 = vld [vmem:[%s4120_s3 + $0x68] sm:$0xff]  }
  0x28   :  { %2589 = vmatprep.subr.bf16.mxu1 %v3515_v26  ;;  %2653 = vmatprep.subr.bf16.mxu0 %v3370_v4  ;;  %v3200_v4 = vld [vmem:[%s4119_s0 + $0xf4] ss:$8 sps:$4 sm:$0xff]  }
  0x2a   :  { %333 = vmatmul.mubr.bf16.gmra.mrb[4].mxu1 %v3521_v27  ;;  %301 = vmatmul.mubr.bf16.gmra.mrb[4].mxu0 %v3527_v28 }
  0x2b   :  { %2590 = vmatpush3.bf16.msra.mxu1 %v3534_v29  ;;  %2654 = vmatpush3.bf16.msra.mxu0 %v3377_v5  ;;  %v3202_v5 = vld [vmem:[%s4119_s0 + $0xf0] ss:$8 sps:$4 sm:$0xff]  }
  0x2c   :  { %2591 = vmatprep.subr.bf16.mxu1 %v3541_v30  ;;  %2655 = vmatprep.subr.bf16.mxu0 %v3384_v6  ;;  %v3199_v6 = vld [vmem:[%s4120_s3 + $0x70] sm:$0xff]  }
  0x2d   :  { %340 = vmatprep.mubr.bf16.mxu1 %v3546_v31  ;;  %308 = vmatprep.mubr.bf16.mxu0 %v3551_v32 }
  0x2f   :  { %2592 = vmatpush3.bf16.msra.mxu1 %v3560_v33  ;;  %2656 = vmatpush3.bf16.msra.mxu0 %v3391_v7  ;;  %v3203_v7 = vld [vmem:[%s4120_s3 + $0x78] sm:$0xff]  }
  0x30   :  { %2593 = vmatprep.subr.bf16.mxu1 %v3567_v34  ;;  %2657 = vmatprep.subr.bf16.mxu0 %v3398_v8  ;;  %v3731_v8 = vld [vmem:[%s4120_s3] sm:$0xff]  }
  0x32   :  { %341 = vmatmul.mubr.bf16.gmra.mrb[8].mxu1 %v3574_v35  ;;  %309 = vmatmul.mubr.bf16.gmra.mrb[8].mxu0 %v3159_v36 }
  0x33   :  { %2594 = vmatpush3.bf16.msra.mxu1 %v3158_v37  ;;  %2658 = vmatpush3.bf16.msra.mxu0 %v3405_v9 }
  0x34   :  { %2595 = vmatprep.subr.bf16.mxu1 %v3160_v38  ;;  %2659 = vmatprep.subr.bf16.mxu0 %v3412_v10 }
  0x35   :  { %346 = vmatprep.mubr.bf16.mxu1 %v3592_v39  ;;  %316 = vmatprep.mubr.bf16.mxu0 %v3166_v40 }
  0x37   :  { %2596 = vmatpush3.bf16.msra.mxu1 %v3161_v41  ;;  %2660 = vmatpush3.bf16.msra.mxu0 %v3424_v12 }
  0x38   :  { %2597 = vmatprep.subr.bf16.mxu1 %v3165_v42  ;;  %2661 = vmatprep.subr.bf16.mxu0 %v3436_v14 }
  0x3a   :  { %347 = vmatmul.mubr.bf16.gmra.mrb[12].mxu1 %v3610_v43  ;;  %317 = vmatmul.mubr.bf16.gmra.mrb[12].mxu0 %v3169_v44 }
  0x3b   :  { %2598 = vmatpush3.bf16.msra.mxu1 %v3168_v45  ;;  %2662 = vmatpush3.bf16.msra.mxu0 %v3445_v15 }
  0x3c   :  { %2599 = vmatprep.subr.bf16.mxu1 %v3170_v46  ;;  %2663 = vmatprep.subr.bf16.mxu0 %v3452_v16 }
  0x3d   :  { %514 = vmatprep.mubr.bf16.mxu1 %v3429_v13  ;;  %716 = vmatprep.mubr.bf16.mxu0 %v3626_v47 }
  0x3f   :  { %2600 = vmatpush3.bf16.msra.mxu1 %v3171_v48  ;;  %2664 = vmatpush3.bf16.msra.mxu0 %v3459_v17 }
  0x40   :  { %2713 = vmatprep.subr.bf16.mxu1 %v3466_v18  ;;  %2902 = vmatprep.subr.bf16.mxu0 %v3190_v60 }
  0x42   :  { %515 = vmatmul.mubr.bf16.vlgmr.msra.gmra.mrb[16].mxu1 %v3476_v20  ;;  %717 = vmatmul.mubr.bf16.vlgmr.msra.gmra.mrb[16].mxu0 %v3172_v49 }
  0x43   :  { %2714 = vmatpush3.bf16.msra.mxu1 %v3483_v21  ;;  %522 = vmatprep.mubr.bf16.mxu1 %v3499_v24 }
  0x44   :  { %2715 = vmatprep.subr.bf16.mxu1 %v3489_v22  ;;  %724 = vmatprep.mubr.bf16.mxu0 %v3175_v50 }
  0x45   :  { %2903 = vmatpush3.bf16.msra.mxu0 %v3190_v60 }
  0x46   :  { %2904 = vmatprep.subr.bf16.mxu0 %v3191_v61 }
  0x47   :  { %2716 = vmatpush3.bf16.msra.mxu1 %v3508_v25 }
  0x48   :  { %2717 = vmatprep.subr.bf16.mxu1 %v3515_v26 }
  0x49   :  { %2905 = vmatpush3.bf16.msra.mxu0 %v3191_v61 }
  0x4a   :  { %523 = vmatmul.mubr.bf16.gmra.mrb[20].mxu1 %v3527_v28  ;;  %725 = vmatmul.mubr.bf16.gmra.mrb[20].mxu0 %v3177_v51 }
  0x4b   :  { %530 = vmatprep.mubr.bf16.mxu1 %v3551_v32  ;;  %732 = vmatprep.mubr.bf16.mxu0 %v3178_v52 }
  0x4c   :  { %2718 = vmatpush3.bf16.msra.mxu1 %v3534_v29  ;;  %2906 = vmatprep.subr.bf16.mxu0 %v3192_v62 }
  0x4d   :  { %2719 = vmatprep.subr.bf16.mxu1 %v3541_v30  ;;  %2907 = vmatpush3.bf16.msra.mxu0 %v3192_v62 }
  0x4e   :  { %2908 = vmatprep.subr.bf16.mxu0 %v3193_v63 }
  0x50   :  { %2720 = vmatpush3.bf16.msra.mxu1 %v3560_v33 }
  0x51   :  { %2721 = vmatprep.subr.bf16.mxu1 %v3567_v34  ;;  %2909 = vmatpush3.bf16.msra.mxu0 %v3193_v63 }
  0x52   :  { %531 = vmatmul.mubr.bf16.gmra.mrb[24].mxu1 %v3159_v36  ;;  %733 = vmatmul.mubr.bf16.gmra.mrb[24].mxu0 %v3180_v53 }
  0x53   :  { %538 = vmatprep.mubr.bf16.mxu1 %v3166_v40  ;;  %740 = vmatprep.mubr.bf16.mxu0 %v3181_v54 }
  0x54   :  { %2722 = vmatpush3.bf16.msra.mxu1 %v3158_v37  ;;  %2910 = vmatprep.subr.bf16.mxu0 %v3194_v0 }
  0x55   :  { %2723 = vmatprep.subr.bf16.mxu1 %v3160_v38  ;;  %2911 = vmatpush3.bf16.msra.mxu0 %v3194_v0 }
  0x56   :  { %2912 = vmatprep.subr.bf16.mxu0 %v3195_v3 }
  0x58   :  { %2724 = vmatpush3.bf16.msra.mxu1 %v3161_v41 }
  0x59   :  { %2725 = vmatprep.subr.bf16.mxu1 %v3165_v42  ;;  %2913 = vmatpush3.bf16.msra.mxu0 %v3195_v3 }
  0x5a   :  { %539 = vmatmul.mubr.bf16.gmra.mrb[28].mxu1 %v3169_v44  ;;  %741 = vmatmul.mubr.bf16.gmra.mrb[28].mxu0 %v3183_v55 }
  0x5b   :  { %546 = vmatprep.mubr.bf16.mxu1 %v3417_v11  ;;  %748 = vmatprep.mubr.bf16.mxu0 %v3184_v56 }
  0x5c   :  { %2726 = vmatpush3.bf16.msra.mxu1 %v3168_v45  ;;  %2914 = vmatprep.subr.bf16.mxu0 %v3199_v6 }
  0x5d   :  { %2727 = vmatprep.subr.bf16.mxu1 %v3170_v46  ;;  %2915 = vmatpush3.bf16.msra.mxu0 %v3199_v6 }
  0x5e   :  { %2916 = vmatprep.subr.bf16.mxu0 %v3203_v7 }
  0x60   :  { %2728 = vmatpush3.bf16.msra.mxu1 %v3171_v48 }
  0x61   :  { %2917 = vmatpush3.bf16.msra.mxu0 %v3203_v7 }
  0x62   :  { %547 = vmatmul.mubr.bf16.gmra.mrb[32].mxu1 %v3471_v19  ;;  %749 = vmatmul.mubr.bf16.gmra.mrb[32].mxu0 %v3186_v57 }
  0x63   :  { %554 = vmatprep.mubr.bf16.mxu1 %v3494_v23  ;;  %756 = vmatprep.mubr.bf16.mxu0 %v3187_v58 }
  0x64   :  { %2926 = vmatprep.subr.bf16.mxu0 %v3731_v8 }
  0x6a   :  { %555 = vmatmul.mubr.bf16.gmra.mrb[36].mxu1 %v3521_v27  ;;  %757 = vmatmul.mubr.bf16.gmra.mrb[36].mxu0 %v3189_v59 }
  0x6b   :  { %562 = vmatprep.mubr.bf16.mxu1 %v3546_v31  ;;  %764 = vmatprep.mubr.bf16.mxu0 %v3196_v1 }
  0x72   :  { %563 = vmatmul.mubr.bf16.gmra.mrb[40].mxu1 %v3574_v35  ;;  %765 = vmatmul.mubr.bf16.gmra.mrb[40].mxu0 %v3198_v2 }
  0x73   :  { %568 = vmatprep.mubr.bf16.mxu1 %v3592_v39  ;;  %770 = vmatprep.mubr.bf16.mxu0 %v3200_v4 }
  0x7a   :  { %569 = vmatmul.mubr.bf16.gmra.mrb[44].mxu1 %v3610_v43  ;;  %771 = vmatmul.mubr.bf16.gmra.mrb[44].mxu0 %v3202_v5 }
  0x7b   :  { %821 = vmatprep.mubr.bf16.mxu1 %v3626_v47 }
  0x82   :  { %822 = vmatmul.mubr.bf16.vlgmr.msra.gmra.mrb[48].mxu1 %v3172_v49 }
  0x83   :  { %829 = vmatprep.mubr.bf16.mxu1 %v3175_v50 }
  0x8a   :  { %830 = vmatmul.mubr.bf16.gmra.mrb[52].mxu1 %v3177_v51 }
  0x8b   :  { %837 = vmatprep.mubr.bf16.mxu1 %v3178_v52 }
  0x92   :  { %838 = vmatmul.mubr.bf16.gmra.mrb[56].mxu1 %v3180_v53 }
  0x93   :  { %845 = vmatprep.mubr.bf16.mxu1 %v3181_v54 }
  0x9a   :  { %846 = vmatmul.mubr.bf16.gmra.mrb[60].mxu1 %v3183_v55 }
  0x9b   :  { %853 = vmatprep.mubr.bf16.mxu1 %v3184_v56 }
  0xa2   :  { %854 = vmatmul.mubr.bf16.gmra.mrb[64].mxu1 %v3186_v57 }
  0xa3   :  { %861 = vmatprep.mubr.bf16.mxu1 %v3187_v58 }
  0xaa   :  { %862 = vmatmul.mubr.bf16.gmra.mrb[68].mxu1 %v3189_v59 }
  0xab   :  { %869 = vmatprep.mubr.bf16.mxu1 %v3196_v1 }
  0xb2   :  { %870 = vmatmul.mubr.bf16.gmra.mrb[72].mxu1 %v3198_v2 }
  0xb3   :  { %875 = vmatprep.mubr.bf16.mxu1 %v3200_v4 }
  0xba   :  { %876 = vmatmul.mubr.bf16.gmra.mrb[76].mxu1 %v3202_v5 }
  0xf5   :  { %v2561_v9 = vpop.f32.mrb[0].mxu1  ;;  %v2537_v10 = vpop.f32.mrb[0].mxu0 }
  0xf6   :  { %v2562_v11 = vpop.f32.mrb[1].mxu1  ;;  %v2538_v12 = vpop.f32.mrb[1].mxu0 }
  0xf7   :  { %v3734_v13 = vadd.f32 %v2562_v11, %v2561_v9  ;;  %v2564_v14 = vpop.f32.mrb[2].mxu1  ;;  %v2539_v15 = vadd.f32 %v2538_v12, %v2537_v10  ;;  %v2540_v16 = vpop.f32.mrb[2].mxu0 }
  0xf8   :  { %v2565_v17 = vpop.f32.mrb[3].mxu1  ;;  %v2541_v18 = vpop.f32.mrb[3].mxu0 }
  0xf9   :  { %v3736_v19 = vadd.f32 %v2565_v17, %v2564_v14  ;;  %v2542_v20 = vadd.f32 %v2541_v18, %v2540_v16 }
  0xfd   :  { %v2567_v21 = vpop.f32.mrb[4].mxu1  ;;  %v2543_v22 = vpop.f32.mrb[4].mxu0 }
  0xfe   :  { %v2568_v23 = vpop.f32.mrb[5].mxu1  ;;  %v2544_v24 = vpop.f32.mrb[5].mxu0 }
  0xff   :  { %v3738_v25 = vadd.f32 %v2568_v23, %v2567_v21  ;;  %v2570_v26 = vpop.f32.mrb[6].mxu1  ;;  %v2545_v27 = vadd.f32 %v2544_v24, %v2543_v22  ;;  %v2546_v28 = vpop.f32.mrb[6].mxu0 }
 0x100   :  { %v2571_v29 = vpop.f32.mrb[7].mxu1  ;;  %v2547_v30 = vpop.f32.mrb[7].mxu0 }
 0x101   :  { %v3740_v31 = vadd.f32 %v2571_v29, %v2570_v26  ;;  %v2548_v32 = vadd.f32 %v2547_v30, %v2546_v28 }
 0x105   :  { %v2573_v33 = vpop.f32.mrb[8].mxu1  ;;  %v2549_v34 = vpop.f32.mrb[8].mxu0 }
 0x106   :  { %v2574_v35 = vpop.f32.mrb[9].mxu1  ;;  %v2550_v36 = vpop.f32.mrb[9].mxu0 }
 0x107   :  { %v2576_v37 = vpop.f32.mrb[10].mxu1  ;;  %v2551_v38 = vadd.f32 %v2550_v36, %v2549_v34  ;;  %v2552_v39 = vpop.f32.mrb[10].mxu0 }
 0x108   :  { %v2577_v40 = vpop.f32.mrb[11].mxu1  ;;  %v2553_v41 = vpop.f32.mrb[11].mxu0 }
 0x109   :  { %v2554_v42 = vadd.f32 %v2553_v41, %v2552_v39 }
 0x10d   :  { %v2579_v43 = vpop.f32.mrb[12].mxu1  ;;  %v2555_v44 = vpop.f32.mrb[12].mxu0 }
 0x10e   :  { %v2580_v45 = vpop.f32.mrb[13].mxu1  ;;  %v2556_v46 = vpop.f32.mrb[13].mxu0 }
 0x10f   :  { %v2582_v47 = vpop.f32.mrb[14].mxu1  ;;  %v3742_v48 = vadd.f32 %v2556_v46, %v2555_v44  ;;  %v2558_v49 = vpop.f32.mrb[14].mxu0 }
 0x110   :  { %v2583_v50 = vpop.f32.mrb[15].mxu1  ;;  %v2559_v51 = vpop.f32.mrb[15].mxu0 }
 0x111   :  { %v3744_v52 = vadd.f32 %v2559_v51, %v2558_v49 }
 0x115   :  { %v2601_v53 = vpop.f32.mrb[16].mxu1  ;;  %v2665_v54 = vpop.f32.mrb[16].mxu0 }
 0x116   :  { %v2602_v55 = vpop.f32.mrb[17].mxu1  ;;  %v2666_v56 = vpop.f32.mrb[17].mxu0 }
 0x117   :  { %v2603_v57 = vadd.f32 %v2602_v55, %v2601_v53  ;;  %v2604_v58 = vpop.f32.mrb[18].mxu1  ;;  %v2667_v59 = vadd.f32 %v2666_v56, %v2665_v54  ;;  %v2668_v60 = vpop.f32.mrb[18].mxu0 }
 0x118   :  { %v2605_v61 = vpop.f32.mrb[19].mxu1  ;;  %v2669_v62 = vpop.f32.mrb[19].mxu0 }
 0x119   :  { %v575_v63 = vmax.f32 %v2539_v15, %v2603_v57  ;;  %v2606_v0 = vadd.f32 %v2605_v61, %v2604_v58  ;;  %v2670_v1 = vadd.f32 %v2669_v62, %v2668_v60 }
 0x11b   :  { %v576_v2 = vmax.f32 %v2542_v20, %v2606_v0  ;;  %v3746_v3 = vmax.f32 %v575_v63, %v2667_v59 }
 0x11d   :  { %v3748_v4 = vmax.f32 %v576_v2, %v2670_v1  ;;  %v2607_v5 = vpop.f32.mrb[20].mxu1  ;;  %v2671_v6 = vpop.f32.mrb[20].mxu0 }
 0x11e   :  { %v2608_v7 = vpop.f32.mrb[21].mxu1  ;;  %v2672_v9 = vpop.f32.mrb[21].mxu0 }
 0x11f   :  { %v2609_v10 = vadd.f32 %v2608_v7, %v2607_v5  ;;  %v2610_v11 = vpop.f32.mrb[22].mxu1  ;;  %v2673_v12 = vadd.f32 %v2672_v9, %v2671_v6  ;;  %v2674_v14 = vpop.f32.mrb[22].mxu0 }
 0x120   :  { %v2611_v16 = vpop.f32.mrb[23].mxu1  ;;  %v2675_v17 = vpop.f32.mrb[23].mxu0 }
 0x121   :  { %v577_v18 = vmax.f32 %v2545_v27, %v2609_v10  ;;  %v2612_v21 = vadd.f32 %v2611_v16, %v2610_v11  ;;  %v2676_v15 = vadd.f32 %v2675_v17, %v2674_v14 }
 0x123   :  { %v578_v22 = vmax.f32 %v2548_v32, %v2612_v21  ;;  %v3750_v23 = vmax.f32 %v577_v18, %v2673_v12 }
 0x125   :  { %v3752_v20 = vmax.f32 %v578_v22, %v2676_v15  ;;  %v2613_v24 = vpop.f32.mrb[24].mxu1  ;;  %v2677_v26 = vpop.f32.mrb[24].mxu0 }
 0x126   :  { %v2614_v28 = vpop.f32.mrb[25].mxu1  ;;  %v2678_v29 = vpop.f32.mrb[25].mxu0 }
 0x127   :  { %v2615_v30 = vadd.f32 %v2614_v28, %v2613_v24  ;;  %v2616_v33 = vpop.f32.mrb[26].mxu1  ;;  %v2679_v34 = vadd.f32 %v2678_v29, %v2677_v26  ;;  %v2680_v35 = vpop.f32.mrb[26].mxu0 }
 0x128   :  { %v2617_v36 = vpop.f32.mrb[27].mxu1  ;;  %v2681_v37 = vpop.f32.mrb[27].mxu0 }
 0x129   :  { %v579_v39 = vmax.f32 %v2551_v38, %v2615_v30  ;;  %v2618_v40 = vadd.f32 %v2617_v36, %v2616_v33  ;;  %v2682_v27 = vadd.f32 %v2681_v37, %v2680_v35 }
 0x12b   :  { %v580_v41 = vmax.f32 %v2554_v42, %v2618_v40  ;;  %v3754_v43 = vmax.f32 %v579_v39, %v2679_v34 }
 0x12d   :  { %v3756_v32 = vmax.f32 %v580_v41, %v2682_v27  ;;  %v2619_v44 = vpop.f32.mrb[28].mxu1  ;;  %v2683_v45 = vpop.f32.mrb[28].mxu0 }
 0x12e   :  { %v2620_v46 = vpop.f32.mrb[29].mxu1  ;;  %v2684_v47 = vpop.f32.mrb[29].mxu0 }
 0x12f   :  { %v2621_v49 = vadd.f32 %v2620_v46, %v2619_v44  ;;  %v2622_v50 = vpop.f32.mrb[30].mxu1  ;;  %v2685_v51 = vadd.f32 %v2684_v47, %v2683_v45  ;;  %v2686_v53 = vpop.f32.mrb[30].mxu0 }
 0x130   :  { %v2623_v54 = vpop.f32.mrb[31].mxu1  ;;  %v2687_v55 = vpop.f32.mrb[31].mxu0 }
 0x131   :  { %v581_v56 = vmax.f32 %v3742_v48, %v2621_v49  ;;  %v2624_v38 = vadd.f32 %v2623_v54, %v2622_v50  ;;  %v2688_v57 = vadd.f32 %v2687_v55, %v2686_v53 }
 0x133   :  { %v582_v42 = vmax.f32 %v3744_v52, %v2624_v38  ;;  %v3760_v58 = vmax.f32 %v581_v56, %v2685_v51 }
 0x135   :  { %v3762_v59 = vmax.f32 %v582_v42, %v2688_v57  ;;  %v2625_v60 = vpop.f32.mrb[32].mxu1  ;;  %v2689_v61 = vpop.f32.mrb[32].mxu0 }
 0x136   :  { %v2626_v62 = vpop.f32.mrb[33].mxu1  ;;  %v2690_v63 = vpop.f32.mrb[33].mxu0 }
 0x137   :  { %v2627_v0 = vadd.f32 %v2626_v62, %v2625_v60  ;;  %v2628_v1 = vpop.f32.mrb[34].mxu1  ;;  %v2691_v2 = vadd.f32 %v2690_v63, %v2689_v61  ;;  %v2692_v5 = vpop.f32.mrb[34].mxu0 }
 0x138   :  { %v2629_v6 = vpop.f32.mrb[35].mxu1  ;;  %v2693_v7 = vpop.f32.mrb[35].mxu0 }
 0x139   :  { %v583_v48 = vmax.f32 %v3734_v13, %v2627_v0  ;;  %v2630_v9 = vadd.f32 %v2629_v6, %v2628_v1  ;;  %v2694_v10 = vadd.f32 %v2693_v7, %v2692_v5 }
 0x13b   :  { %v584_v52 = vmax.f32 %v3736_v19, %v2630_v9  ;;  %v3766_v11 = vmax.f32 %v583_v48, %v2691_v2 }
 0x13d   :  { %v3768_v12 = vmax.f32 %v584_v52, %v2694_v10  ;;  %v2631_v14 = vpop.f32.mrb[36].mxu1  ;;  %v2695_v16 = vpop.f32.mrb[36].mxu0 }
 0x13e   :  { %v2632_v17 = vpop.f32.mrb[37].mxu1  ;;  %v2696_v18 = vpop.f32.mrb[37].mxu0 }
 0x13f   :  { %v2633_v21 = vadd.f32 %v2632_v17, %v2631_v14  ;;  %v2634_v15 = vpop.f32.mrb[38].mxu1  ;;  %v2697_v22 = vadd.f32 %v2696_v18, %v2695_v16  ;;  %v2698_v24 = vpop.f32.mrb[38].mxu0 }
 0x140   :  { %v2635_v26 = vpop.f32.mrb[39].mxu1  ;;  %v2699_v28 = vpop.f32.mrb[39].mxu0 }
 0x141   :  { %v585_v13 = vmax.f32 %v3738_v25, %v2633_v21  ;;  %v2636_v29 = vadd.f32 %v2635_v26, %v2634_v15  ;;  %v2700_v30 = vadd.f32 %v2699_v28, %v2698_v24 }
 0x143   :  { %v586_v19 = vmax.f32 %v3740_v31, %v2636_v29  ;;  %v3772_v33 = vmax.f32 %v585_v13, %v2697_v22  ;;  %v3779_v31 = vld [vmem:[%s4121_s2] ss:$0 sm:$0xff] }
 0x145   :  { %v3774_v34 = vmax.f32 %v586_v19, %v2700_v30  ;;  %v2637_v35 = vpop.f32.mrb[40].mxu1 }
 0x146   :  { %v2638_v36 = vpop.f32.mrb[41].mxu1 }
 0x147   :  { %v2640_v37 = vpop.f32.mrb[42].mxu1 }
 0x148   :  { %v2641_v39 = vpop.f32.mrb[43].mxu1 }
 0x149   :  { %v3206_v39 = vld [vmem:[%s4120_s3 + $0x10] sm:$0xff]  }
 0x14d   :  { %v2643_v40 = vpop.f32.mrb[44].mxu1 }
 0x14e   :  { %v2644_v27 = vpop.f32.mrb[45].mxu1 }
 0x14f   :  { %v2646_v41 = vpop.f32.mrb[46].mxu1 }
 0x150   :  { %v2647_v44 = vpop.f32.mrb[47].mxu1 }
 0x155   :  { %v2729_v45 = vpop.f32.mrb[48].mxu1 }
 0x156   :  { %v2730_v46 = vpop.f32.mrb[49].mxu1 }
 0x157   :  { %v2731_v47 = vadd.f32 %v2730_v46, %v2729_v45  ;;  %v2732_v25 = vpop.f32.mrb[50].mxu1 }
 0x158   :  { %v2733_v49 = vpop.f32.mrb[51].mxu1 }
 0x159   :  { %v882_v50 = vmax.f32 %v3746_v3, %v2731_v47  ;;  %v2734_v51 = vadd.f32 %v2733_v49, %v2732_v25 }
 0x15b   :  { %v901_v53 = vadd.f32 %v3779_v31, %v882_v50  ;;  %v883_v54 = vmax.f32 %v3748_v4, %v2734_v51  ;;  %v3208_v50 = vld [vmem:[%s4120_s3 + $0x20] sm:$0xff]  }
 0x15d   :  { %v902_v55 = vadd.f32 %v3779_v31, %v883_v54  ;;  %v2735_v56 = vpop.f32.mrb[52].mxu1  ;;  %v913_v57 = vmax.f32 %v901_v53, 0.0  ;;  %v3236_v53 = vld [vmem:[%s4122_s5] sm:$0xff]  }
 0x15e   :  { %v2736_v38 = vpop.f32.mrb[53].mxu1  ;;  %3022 = vmatprep.subr.bf16.mxu1 %v3236_v53 }
 0x15f   :  { %v914_v42 = vmax.f32 %v902_v55, 0.0  ;;  %v2737_v60 = vadd.f32 %v2736_v38, %v2735_v56  ;;  %v2738_v61 = vpop.f32.mrb[54].mxu1  ;;  %3023 = vmatpush3.bf16.msra.mxu1 %v3236_v53  ;;  %v3225_v53 = vld [vmem:[%s4120_s3 + $0xe8] sm:$0xff]  }
 0x160   :  { %v2739_v62 = vpop.f32.mrb[55].mxu1 }
 0x161   :  { %v884_v63 = vmax.f32 %v3750_v23, %v2737_v60  ;;  %v2740_v0 = vadd.f32 %v2739_v62, %v2738_v61  ;;  %v3786_v1 = vpack.c.bf16 %v914_v42, %v913_v57 }
 0x163   :  { %v903_v3 = vadd.f32 %v3779_v31, %v884_v63  ;;  %v885_v2 = vmax.f32 %v3752_v20, %v2740_v0  ;;  %v3238_v0 = vld [vmem:[%s4122_s5 + $0x10] sm:$0xff]  }
 0x165   :  { %v915_v5 = vmax.f32 %v903_v3, 0.0  ;;  %v904_v4 = vadd.f32 %v3779_v31, %v885_v2  ;;  %v2741_v6 = vpop.f32.mrb[56].mxu1 }
 0x166   :  { %v2742_v7 = vpop.f32.mrb[57].mxu1 }
 0x167   :  { %v916_v48 = vmax.f32 %v904_v4, 0.0  ;;  %v2743_v9 = vadd.f32 %v2742_v7, %v2741_v6  ;;  %v2744_v10 = vpop.f32.mrb[58].mxu1  ;;  %v945_v52 = vpack.c.bf16 %v915_v5, %v914_v42  ;;  %v3239_v6 = vld [vmem:[%s4122_s5 + $0x18] sm:$0xff]  }
 0x168   :  { %v2745_v14 = vpop.f32.mrb[59].mxu1 }
 0x169   :  { %v3791_v16 = vpack.c.bf16 %v916_v48, %v915_v5  ;;  %v886_v23 = vmax.f32 %v3754_v43, %v2743_v9  ;;  %v2746_v17 = vadd.f32 %v2745_v14, %v2744_v10  ;;  %2918 = vmatprep.mubr.bf16.mxu0 %v945_v52  ;;  %v3205_v43 = vld [vmem:[%s4120_s3 + $0x8] sm:$0xff]  }
 0x16b   :  { %v905_v18 = vadd.f32 %v3779_v31, %v886_v23  ;;  %v887_v20 = vmax.f32 %v3756_v32, %v2746_v17  ;;  %v3212_v17 = vld [vmem:[%s4120_s3 + $0x80] sm:$0xff]  }
 0x16d   :  { %v917_v21 = vmax.f32 %v905_v18, 0.0  ;;  %v906_v15 = vadd.f32 %v3779_v31, %v887_v20  ;;  %v2747_v22 = vpop.f32.mrb[60].mxu1  ;;  %v3213_v18 = vld [vmem:[%s4120_s3 + $0x88] sm:$0xff]   ;;  %v3242_v20 = vld [vmem:[%s4122_s5 + $0x30] sm:$0xff]  }
 0x16e   :  { %v2748_v24 = vpop.f32.mrb[61].mxu1 }
 0x16f   :  { %v3797_v26 = vpack.c.bf16 %v917_v21, %v916_v48  ;;  %v918_v28 = vmax.f32 %v906_v15, 0.0  ;;  %v2749_v13 = vadd.f32 %v2748_v24, %v2747_v22  ;;  %v2750_v29 = vpop.f32.mrb[62].mxu1  ;;  %v3215_v15 = vld [vmem:[%s4120_s3 + $0x98] sm:$0xff]   ;;  %v3216_v22 = vld [vmem:[%s4120_s3 + $0xa0] sm:$0xff]   ;;  %v3217_v24 = vld [vmem:[%s4120_s3 + $0xa8] sm:$0xff]  }
 0x170   :  { %v2751_v30 = vpop.f32.mrb[63].mxu1 }
 0x171   :  { %v888_v19 = vmax.f32 %v3760_v58, %v2749_v13  ;;  %v2752_v35 = vadd.f32 %v2751_v30, %v2750_v29  ;;  %2919 = vmatmul.mubr.bf16.vlgmr.msra.gmra.mrb[48].mxu0 %v3797_v26  ;;  %v3804_v32 = vpack.c.bf16 %v918_v28, %v917_v21  ;;  %v3214_v21 = vld [vmem:[%s4120_s3 + $0x90] sm:$0xff]   ;;  %v3220_v13 = vld [vmem:[%s4120_s3 + $0xc0] sm:$0xff]   ;;  %v3221_v29 = vld [vmem:[%s4120_s3 + $0xc8] sm:$0xff]  }
 0x172   :  { %2927 = vmatpush3.bf16.msra.mxu0 %v3731_v8 }
 0x173   :  { %v907_v36 = vadd.f32 %v3779_v31, %v888_v19  ;;  %v889_v37 = vmax.f32 %v3762_v59, %v2752_v35  ;;  %2928 = vmatprep.subr.bf16.mxu0 %v3205_v43  ;;  %v3207_v59 = vld [vmem:[%s4120_s3 + $0x18] sm:$0xff]  }
 0x175   :  { %v919_v40 = vmax.f32 %v907_v36, 0.0  ;;  %v908_v27 = vadd.f32 %v3779_v31, %v889_v37  ;;  %v2753_v58 = vpop.f32.mrb[64].mxu1  ;;  %v3222_v36 = vld [vmem:[%s4120_s3 + $0xd0] sm:$0xff]  }
 0x176   :  { %2929 = vmatpush3.bf16.msra.mxu0 %v3205_v43  ;;  %v2754_v41 = vpop.f32.mrb[65].mxu1  ;;  %v2701_v43 = vpop.f32.mrb[40].mxu0 }
 0x177   :  { %v920_v44 = vmax.f32 %v908_v27, 0.0  ;;  %v2755_v45 = vadd.f32 %v2754_v41, %v2753_v58  ;;  %v2756_v46 = vpop.f32.mrb[66].mxu1  ;;  %2930 = vmatprep.subr.bf16.mxu0 %v3206_v39  ;;  %v3813_v8 = vpack.c.bf16 %v919_v40, %v918_v28  ;;  %v3218_v28 = vld [vmem:[%s4120_s3 + $0xb0] sm:$0xff]   ;;  %v2702_v19 = vpop.f32.mrb[41].mxu0  ;;  %v3223_v58 = vld [vmem:[%s4120_s3 + $0xd8] sm:$0xff]  }
 0x178   :  { %v2757_v47 = vpop.f32.mrb[67].mxu1  ;;  %v2704_v37 = vpop.f32.mrb[42].mxu0  ;;  %v3249_v43 = vld [vmem:[%s4123_s6 + $0x10] sm:$0xff]   ;;  %v3250_v19 = vld [vmem:[%s4123_s6 + $0x58] sm:$0xff]  }
 0x179   :  { %v890_v25 = vmax.f32 %v3766_v11, %v2755_v45  ;;  %v2758_v49 = vadd.f32 %v2757_v47, %v2756_v46  ;;  %2922 = vmatprep.mubr.bf16.mxu0 %v3813_v8  ;;  %v3823_v51 = vpack.c.bf16 %v920_v44, %v919_v40  ;;  %v3237_v11 = vld [vmem:[%s4122_s5 + $0x8] sm:$0xff]   ;;  %v2705_v40 = vpop.f32.mrb[43].mxu0  ;;  %v3253_v37 = vld [vmem:[%s4123_s6 + $0x20] sm:$0xff]  }
 0x17a   :  { %2931 = vmatpush3.bf16.msra.mxu0 %v3206_v39  ;;  %3024 = vmatprep.subr.bf16.mxu1 %v3237_v11  ;;  %v2707_v41 = vpop.f32.mrb[44].mxu0  ;;  %v3255_v40 = vld [vmem:[%s4123_s6 + $0x28] sm:$0xff]  }
 0x17b   :  { %v909_v54 = vadd.f32 %v3779_v31, %v890_v25  ;;  %v891_v55 = vmax.f32 %v3768_v12, %v2758_v49  ;;  %2932 = vmatprep.subr.bf16.mxu0 %v3207_v59  ;;  %v3209_v12 = vld [vmem:[%s4120_s3 + $0x28] sm:$0xff]   ;;  %3025 = vmatpush3.bf16.msra.mxu1 %v3237_v11  ;;  %v2708_v45 = vpop.f32.mrb[45].mxu0  ;;  %v3258_v41 = vld [vmem:[%s4123_s6 + $0x78] sm:$0xff]  }
 0x17c   :  { %3026 = vmatprep.subr.bf16.mxu1 %v3238_v0  ;;  %v2710_v47 = vpop.f32.mrb[46].mxu0  ;;  %v3229_v11 = vld [vmem:[%s4120_s3 + $0x108] sm:$0xff]   ;;  %v3260_v45 = vld [vmem:[%s4123_s6 + $0xc0] sm:$0xff]  }
 0x17d   :  { %v921_v56 = vmax.f32 %v909_v54, 0.0  ;;  %v910_v38 = vadd.f32 %v3779_v31, %v891_v55  ;;  %v2759_v57 = vpop.f32.mrb[68].mxu1  ;;  %v2711_v49 = vpop.f32.mrb[47].mxu0  ;;  %v3227_v54 = vld [vmem:[%s4120_s3 + $0xf8] sm:$0xff]   ;;  %v3228_v55 = vld [vmem:[%s4120_s3 + $0x100] sm:$0xff]  }
 0x17e   :  { %2933 = vmatpush3.bf16.msra.mxu0 %v3207_v59  ;;  %v2760_v42 = vpop.f32.mrb[69].mxu1  ;;  %v3224_v59 = vld [vmem:[%s4120_s3 + $0xe0] sm:$0xff]  }
 0x17f   :  { %v922_v60 = vmax.f32 %v910_v38, 0.0  ;;  %v2761_v61 = vadd.f32 %v2760_v42, %v2759_v57  ;;  %v2762_v62 = vpop.f32.mrb[70].mxu1  ;;  %2934 = vmatprep.subr.bf16.mxu0 %v3208_v50  ;;  %v3834_v63 = vpack.c.bf16 %v921_v56, %v920_v44  ;;  %3027 = vmatpush3.bf16.msra.mxu1 %v3238_v0  ;;  %v3231_v38 = vld [vmem:[%s4120_s3 + $0x118] sm:$0xff]   ;;  %v3233_v57 = vld [vmem:[%s4120_s3 + $0x128] sm:$0xff]   ;;  %v3234_v42 = vld [vmem:[%s4120_s3 + $0x130] sm:$0xff]  }
 0x180   :  { %v2763_v3 = vpop.f32.mrb[71].mxu1  ;;  %3028 = vmatprep.subr.bf16.mxu1 %v3239_v6 }
 0x181   :  { %v892_v2 = vmax.f32 %v3772_v33, %v2761_v61  ;;  %v2764_v5 = vadd.f32 %v2763_v3, %v2762_v62  ;;  %2923 = vmatmul.mubr.bf16.gmra.mrb[52].mxu0 %v3834_v63  ;;  %v3844_v4 = vpack.c.bf16 %v922_v60, %v921_v56  ;;  %v3210_v33 = vld [vmem:[%s4120_s3 + $0x30] sm:$0xff]   ;;  %v3244_v61 = vld [vmem:[%s4123_s6 + $0x40] sm:$0xff]  }
 0x182   :  { %2935 = vmatpush3.bf16.msra.mxu0 %v3208_v50  ;;  %2942 = vmatprep.mubr.bf16.mxu0 %v3786_v1  ;;  %v3240_v1 = vld [vmem:[%s4122_s5 + $0x20] sm:$0xff]   ;;  %v3230_v56 = vld [vmem:[%s4120_s3 + $0x110] sm:$0xff]  }
 0x183   :  { %v911_v7 = vadd.f32 %v3779_v31, %v892_v2  ;;  %v893_v48 = vmax.f32 %v3774_v34, %v2764_v5  ;;  %2936 = vmatprep.subr.bf16.mxu0 %v3209_v12  ;;  %v3211_v34 = vld [vmem:[%s4120_s3 + $0x38] sm:$0xff]   ;;  %3029 = vmatpush3.bf16.msra.mxu1 %v3239_v6  ;;  %v2470_v62 = vld [vmem:[%s4124_s4] ss:$0 sm:$0xff] }
 0x184   :  { %3030 = vmatprep.subr.bf16.mxu1 %v3240_v1 }
 0x185   :  { %v923_v9 = vmax.f32 %v911_v7, 0.0  ;;  %v912_v10 = vadd.f32 %v3779_v31, %v893_v48  ;;  %v3241_v31 = vld [vmem:[%s4122_s5 + $0x28] sm:$0xff]   ;;  %v2765_v30 = vpop.f32.mrb[72].mxu1 }
 0x186   :  { %2937 = vmatpush3.bf16.msra.mxu0 %v3209_v12  ;;  %v2766_v35 = vpop.f32.mrb[73].mxu1 }
 0x187   :  { %v924_v52 = vmax.f32 %v912_v10, 0.0  ;;  %2938 = vmatprep.subr.bf16.mxu0 %v3210_v33  ;;  %v3862_v14 = vpack.c.bf16 %v923_v9, %v922_v60  ;;  %3031 = vmatpush3.bf16.msra.mxu1 %v3240_v1  ;;  %v2768_v39 = vpop.f32.mrb[74].mxu1  ;;  %v3243_v60 = vld [vmem:[%s4122_s5 + $0x38] sm:$0xff]   ;;  %v3245_v1 = vld [vmem:[%s4123_s6] sm:$0xff]  }
 0x188   :  { %3032 = vmatprep.subr.bf16.mxu1 %v3241_v31  ;;  %v2769_v27 = vpop.f32.mrb[75].mxu1  ;;  %v3251_v35 = vld [vmem:[%s4123_s6 + $0x18] sm:$0xff]   ;;  %v3254_v39 = vld [vmem:[%s4123_s6 + $0x68] sm:$0xff]  }
 0x189   :  { %v3864_v23 = vpack.c.bf16 %v924_v52, %v923_v9  ;;  %v3256_v27 = vld [vmem:[%s4123_s6 + $0x70] sm:$0xff]  }
 0x18a   :  { %2939 = vmatpush3.bf16.msra.mxu0 %v3210_v33 }
 0x18b   :  { %2940 = vmatprep.subr.bf16.mxu0 %v3211_v34  ;;  %3033 = vmatpush3.bf16.msra.mxu1 %v3241_v31 }
 0x18c   :  { %3034 = vmatprep.subr.bf16.mxu1 %v3242_v20 }
 0x18d   :  { %v2771_v44 = vpop.f32.mrb[76].mxu1 }
 0x18e   :  { %2941 = vmatpush3.bf16.msra.mxu0 %v3211_v34  ;;  %v2772_v46 = vpop.f32.mrb[77].mxu1  ;;  %v3259_v44 = vld [vmem:[%s4123_s6 + $0x38] sm:$0xff]  }
 0x18f   :  { %2950 = vmatprep.subr.bf16.mxu0 %v3212_v17  ;;  %3035 = vmatpush3.bf16.msra.mxu1 %v3242_v20  ;;  %v2774_v25 = vpop.f32.mrb[78].mxu1 }
 0x190   :  { %v2775_v50 = vpop.f32.mrb[79].mxu1  ;;  %3036 = vmatprep.subr.bf16.mxu1 %v3243_v60 }
 0x191   :  { %2943 = vmatmul.mubr.bf16.vlgmr.msra.gmra.mrb[48].mxu0 %v3791_v16 }
 0x192   :  { %2946 = vmatprep.mubr.bf16.mxu0 %v3804_v32  ;;  %2951 = vmatpush3.bf16.msra.mxu0 %v3212_v17 }
 0x193   :  { %2952 = vmatprep.subr.bf16.mxu0 %v3213_v18  ;;  %3037 = vmatpush3.bf16.msra.mxu1 %v3243_v60 }
 0x194   :  { %2849 = vmatprep.subr.bf16.mxu1 %v3244_v61 }
 0x196   :  { %2953 = vmatpush3.bf16.msra.mxu0 %v3213_v18 }
 0x197   :  { %2954 = vmatprep.subr.bf16.mxu0 %v3214_v21 }
 0x199   :  { %2947 = vmatmul.mubr.bf16.gmra.mrb[52].mxu0 %v3823_v51 }
 0x19a   :  { %2955 = vmatpush3.bf16.msra.mxu0 %v3214_v21  ;;  %2966 = vmatprep.mubr.bf16.mxu0 %v3791_v16  ;;  %v3219_v16 = vld [vmem:[%s4120_s3 + $0xb8] sm:$0xff]  }
 0x19b   :  { %2956 = vmatprep.subr.bf16.mxu0 %v3215_v15 }
 0x19e   :  { %2957 = vmatpush3.bf16.msra.mxu0 %v3215_v15  ;;  %v3247_v15 = vld [vmem:[%s4123_s6 + $0x8] sm:$0xff]  }
 0x19f   :  { %2958 = vmatprep.subr.bf16.mxu0 %v3216_v22 }
 0x1a2   :  { %2959 = vmatpush3.bf16.msra.mxu0 %v3216_v22 }
 0x1a3   :  { %2960 = vmatprep.subr.bf16.mxu0 %v3217_v24 }
 0x1a6   :  { %2961 = vmatpush3.bf16.msra.mxu0 %v3217_v24  ;;  %v3248_v24 = vld [vmem:[%s4123_s6 + $0x50] sm:$0xff]  }
 0x1a7   :  { %2962 = vmatprep.subr.bf16.mxu0 %v3218_v28 }
 0x1aa   :  { %2963 = vmatpush3.bf16.msra.mxu0 %v3218_v28 }
 0x1ab   :  { %2964 = vmatprep.subr.bf16.mxu0 %v3219_v16 }
 0x1ae   :  { %2965 = vmatpush3.bf16.msra.mxu0 %v3219_v16 }
 0x1af   :  { %2974 = vmatprep.subr.bf16.mxu0 %v3220_v13 }
 0x1b1   :  { %2967 = vmatmul.mubr.bf16.vlgmr.msra.gmra.mrb[48].mxu0 %v3804_v32 }
 0x1b2   :  { %2970 = vmatprep.mubr.bf16.mxu0 %v3823_v51  ;;  %2975 = vmatpush3.bf16.msra.mxu0 %v3220_v13 }
 0x1b3   :  { %2976 = vmatprep.subr.bf16.mxu0 %v3221_v29 }
 0x1b6   :  { %2977 = vmatpush3.bf16.msra.mxu0 %v3221_v29 }
 0x1b7   :  { %2978 = vmatprep.subr.bf16.mxu0 %v3222_v36 }
 0x1b9   :  { %2971 = vmatmul.mubr.bf16.gmra.mrb[52].mxu0 %v3844_v4 }
 0x1ba   :  { %2979 = vmatpush3.bf16.msra.mxu0 %v3222_v36  ;;  %2990 = vmatprep.mubr.bf16.mxu0 %v3797_v26  ;;  %v3226_v26 = vld [vmem:[%s4120_s3 + $0xf0] sm:$0xff]   ;;  %v3252_v36 = vld [vmem:[%s4123_s6 + $0x60] sm:$0xff]  }
 0x1bb   :  { %2980 = vmatprep.subr.bf16.mxu0 %v3223_v58 }
 0x1be   :  { %2981 = vmatpush3.bf16.msra.mxu0 %v3223_v58  ;;  %v3257_v58 = vld [vmem:[%s4123_s6 + $0x30] sm:$0xff]  }
 0x1bf   :  { %2982 = vmatprep.subr.bf16.mxu0 %v3224_v59 }
 0x1c2   :  { %2983 = vmatpush3.bf16.msra.mxu0 %v3224_v59 }
 0x1c3   :  { %2984 = vmatprep.subr.bf16.mxu0 %v3225_v53 }
 0x1c6   :  { %2985 = vmatpush3.bf16.msra.mxu0 %v3225_v53 }
 0x1c7   :  { %2986 = vmatprep.subr.bf16.mxu0 %v3226_v26 }
 0x1ca   :  { %2987 = vmatpush3.bf16.msra.mxu0 %v3226_v26 }
 0x1cb   :  { %2988 = vmatprep.subr.bf16.mxu0 %v3227_v54 }
 0x1ce   :  { %2989 = vmatpush3.bf16.msra.mxu0 %v3227_v54 }
 0x1cf   :  { %2998 = vmatprep.subr.bf16.mxu0 %v3228_v55 }
 0x1d1   :  { %2991 = vmatmul.mubr.bf16.vlgmr.msra.gmra.mrb[48].mxu0 %v3813_v8  ;;  %v3232_v8 = vld [vmem:[%s4120_s3 + $0x120] sm:$0xff]  }
 0x1d2   :  { %2994 = vmatprep.mubr.bf16.mxu0 %v3834_v63  ;;  %2999 = vmatpush3.bf16.msra.mxu0 %v3228_v55 }
 0x1d3   :  { %3000 = vmatprep.subr.bf16.mxu0 %v3229_v11 }
 0x1d6   :  { %3001 = vmatpush3.bf16.msra.mxu0 %v3229_v11 }
 0x1d7   :  { %3002 = vmatprep.subr.bf16.mxu0 %v3230_v56 }
 0x1d9   :  { %2995 = vmatmul.mubr.bf16.gmra.mrb[52].mxu0 %v3862_v14  ;;  %v3246_v14 = vld [vmem:[%s4123_s6 + $0x48] sm:$0xff]  }
 0x1da   :  { %3003 = vmatpush3.bf16.msra.mxu0 %v3230_v56  ;;  %3014 = vmatprep.mubr.bf16.mxu0 %v3804_v32  ;;  %v3235_v32 = vld [vmem:[%s4120_s3 + $0x138] sm:$0xff]   ;;  %v3261_v56 = vld [vmem:[%s4123_s6 + $0x80] sm:$0xff]  }
 0x1db   :  { %3004 = vmatprep.subr.bf16.mxu0 %v3231_v38 }
 0x1de   :  { %3005 = vmatpush3.bf16.msra.mxu0 %v3231_v38 }
 0x1df   :  { %3006 = vmatprep.subr.bf16.mxu0 %v3232_v8 }
 0x1e2   :  { %3007 = vmatpush3.bf16.msra.mxu0 %v3232_v8 }
 0x1e3   :  { %3008 = vmatprep.subr.bf16.mxu0 %v3233_v57 }
 0x1e6   :  { %3009 = vmatpush3.bf16.msra.mxu0 %v3233_v57  ;;  %v3262_v57 = vld [vmem:[%s4123_s6 + $0xc8] sm:$0xff]  }
 0x1e7   :  { %3010 = vmatprep.subr.bf16.mxu0 %v3234_v42 }
 0x1ea   :  { %3011 = vmatpush3.bf16.msra.mxu0 %v3234_v42 }
 0x1eb   :  { %3012 = vmatprep.subr.bf16.mxu0 %v3235_v32 }
 0x1ee   :  { %3013 = vmatpush3.bf16.msra.mxu0 %v3235_v32 }
 0x1f1   :  { %3015 = vmatmul.mubr.bf16.vlgmr.msra.gmra.mrb[48].mxu0 %v3823_v51 }
 0x1f2   :  { %3018 = vmatprep.mubr.bf16.mxu0 %v3844_v4 }
 0x1f9   :  { %3019 = vmatmul.mubr.bf16.gmra.mrb[52].mxu0 %v3864_v23 }
 0x2c4   :  { %v3016_v51 = vpop.f32.mrb[48].mxu0 }
 0x2c5   :  { %v1570_v63 = vpop.f32.mrb[49].mxu0  ;;  %v3970_v3 = vadd.f32 %v3016_v51, %v2470_v62  ;;  %v3263_v51 = vld [vmem:[%s4123_s6 + $0x88] sm:$0xff]  }
 0x2c6   :  { %v3968_v12 = vadd.f32 %v2470_v62, %v1570_v63  ;;  %v3017_v0 = vpop.f32.mrb[50].mxu0 }
 0x2c7   :  { %v3972_v2 = vadd.f32 %v3017_v0, %v2470_v62  ;;  %v1573_v5 = vpop.f32.mrb[51].mxu0  ;;  %v1626_v33 = vmax.f32 %v3970_v3, 0.0  ;;  %v3264_v0 = vld [vmem:[%s4123_s6 + $0xd0] sm:$0xff]  }
 0x2c8   :  { %v3974_v4 = vadd.f32 %v2470_v62, %v1573_v5  ;;  %v1624_v7 = vmax.f32 %v3968_v12, 0.0 }
 0x2c9   :  { %v1627_v6 = vmax.f32 %v3972_v2, 0.0 }
 0x2ca   :  { %v1625_v48 = vmax.f32 %v3974_v4, 0.0  ;;  %v3265_v4 = vld [vmem:[%s4123_s6 + $0x90] sm:$0xff]  }
 0x2cb   :  { %v1633_v52 = vpack.c.bf16 %v1627_v6, %v1626_v33 }
 0x2cc   :  { %v1632_v9 = vpack.c.bf16 %v1625_v48, %v1624_v7  ;;  %v3020_v10 = vpop.f32.mrb[52].mxu0 }
 0x2cd   :  { %v1586_v34 = vpop.f32.mrb[53].mxu0  ;;  %v3988_v17 = vadd.f32 %v3020_v10, %v2470_v62  ;;  %v3271_v10 = vld [vmem:[%s4123_s6 + $0xa8] sm:$0xff]  }
 0x2ce   :  { %v3986_v23 = vadd.f32 %v2470_v62, %v1586_v34  ;;  %v3021_v31 = vpop.f32.mrb[54].mxu0  ;;  %3038 = vmatprep.mubr.bf16.mxu1 %v1632_v9  ;;  %v3270_v9 = vld [vmem:[%s4123_s6 + $0xe8] sm:$0xff]   ;;  %v3274_v34 = vld [vmem:[%s4123_s6 + $0xf8] sm:$0xff]  }
 0x2cf   :  { %v3990_v18 = vadd.f32 %v3021_v31, %v2470_v62  ;;  %v1589_v20 = vpop.f32.mrb[55].mxu0  ;;  %3039 = vmatmul.mubr.bf16.vlgmr.msra.gmra.mrb[80].mxu1 %v1633_v52  ;;  %v1630_v13 = vmax.f32 %v3988_v17, 0.0  ;;  %v3273_v52 = vld [vmem:[%s4123_s6 + $0xb0] sm:$0xff]   ;;  %v3288_v31 = vmov 0.0   ;;  %v3276_v17 = vld [vmem:[%s4125_s8] sm:$0xff]  }
 0x2d0   :  { %v3992_v21 = vadd.f32 %v2470_v62, %v1589_v20  ;;  %2850 = vmatpush3.bf16.msra.mxu1 %v3245_v1  ;;  %v1628_v28 = vmax.f32 %v3986_v23, 0.0  ;;  %v3272_v1 = vld [vmem:[%s4123_s6 + $0xf0] sm:$0xff]  }
 0x2d1   :  { %v1631_v22 = vmax.f32 %v3990_v18, 0.0  ;;  %2851 = vmatprep.subr.bf16.mxu1 %v3246_v14  ;;  %v3275_v14 = vld [vmem:[%s4123_s6 + $0xb8] sm:$0xff]   ;;  %v3277_v18 = vld [vmem:[%s4125_s8 + $0x8] sm:$0xff]   ;;  %v3278_v20 = vld [vmem:[%s4125_s8 + $0x10] sm:$0xff]  }
 0x2d2   :  { %v1629_v16 = vmax.f32 %v3992_v21, 0.0  ;;  %v3279_v21 = vld [vmem:[%s4125_s8 + $0x18] sm:$0xff]  }
 0x2d3   :  { %v1635_v30 = vpack.c.bf16 %v1631_v22, %v1630_v13 }
 0x2d4   :  { %v1634_v29 = vpack.c.bf16 %v1629_v16, %v1628_v28  ;;  %2852 = vmatpush3.bf16.msra.mxu1 %v3247_v15  ;;  %v3280_v15 = vld [vmem:[%s4125_s8 + $0x20] sm:$0xff]  }
 0x2d5   :  { %2853 = vmatprep.subr.bf16.mxu1 %v3248_v24  ;;  %v3282_v24 = vld [vmem:[%s4125_s8 + $0x30] sm:$0xff]  }
 0x2d6   :  { %3042 = vmatprep.mubr.bf16.mxu1 %v1634_v29 }
 0x2d7   :  { %3043 = vmatmul.mubr.bf16.gmra.mrb[84].mxu1 %v1635_v30 }
 0x2d8   :  { %2854 = vmatpush3.bf16.msra.mxu1 %v3249_v43 }
 0x2d9   :  { %2855 = vmatprep.subr.bf16.mxu1 %v3250_v19  ;;  %v2479_v19 = vld [vmem:[%s4126_s7] ss:$0 sm:$0xff] }
 0x2dc   :  { %2856 = vmatpush3.bf16.msra.mxu1 %v3251_v35 }
 0x2dd   :  { %2857 = vmatprep.subr.bf16.mxu1 %v3252_v36 }
 0x2e0   :  { %2858 = vmatpush3.bf16.msra.mxu1 %v3253_v37 }
 0x2e1   :  { %2859 = vmatprep.subr.bf16.mxu1 %v3254_v39 }
 0x2e4   :  { %2860 = vmatpush3.bf16.msra.mxu1 %v3255_v40 }
 0x2e5   :  { %2861 = vmatprep.subr.bf16.mxu1 %v3256_v27 }
 0x2e8   :  { %2862 = vmatpush3.bf16.msra.mxu1 %v3257_v58 }
 0x2e9   :  { %2863 = vmatprep.subr.bf16.mxu1 %v3258_v41 }
 0x2ec   :  { %2864 = vmatpush3.bf16.msra.mxu1 %v3259_v44 }
 0x2ed   :  { %2871 = vmatprep.subr.bf16.mxu1 %v3260_v45  ;;  %v2512_v45 = vld [vmem:[%s4127_s9] ss:$0 sm:$0xff] }
 0x3a2   :  { %v3040_v46 = vpop.f32.mrb[80].mxu1 }
 0x3a3   :  { %v1734_v59 = vpop.f32.mrb[81].mxu1  ;;  %v1767_v25 = vmax.f32 %v1626_v33, %v3040_v46  ;;  %v3269_v33 = vld [vmem:[%s4123_s6 + $0xa0] sm:$0xff]  }
 0x3a4   :  { %v3041_v47 = vpop.f32.mrb[82].mxu1  ;;  %v1765_v53 = vmax.f32 %v1624_v7, %v1734_v59  ;;  %v3267_v7 = vld [vmem:[%s4123_s6 + $0x98] sm:$0xff]  }
 0x3a5   :  { %v1768_v49 = vmax.f32 %v1627_v6, %v3041_v47  ;;  %v1737_v50 = vpop.f32.mrb[83].mxu1  ;;  %v3266_v6 = vld [vmem:[%s4123_s6 + $0xd8] sm:$0xff]  }
 0x3a6   :  { %v1766_v26 = vmax.f32 %v1625_v48, %v1737_v50  ;;  %v3268_v48 = vld [vmem:[%s4123_s6 + $0xe0] sm:$0xff]  }
 0x3a7   :  { %v1774_v54 = vmax.f32 %v1767_v25, %v1768_v49 }
 0x3a8   :  { %v1773_v55 = vmax.f32 %v1765_v53, %v1766_v26 }
 0x3a9   :  { %v1778_v11 = vpack.c.bf16 %v1774_v54, %v1774_v54 }
 0x3aa   :  { %v1777_v38 = vpack.c.bf16 %v1773_v55, %v1773_v55  ;;  %v3044_v8 = vpop.f32.mrb[84].mxu1 }
 0x3ab   :  { %v1750_v42 = vpop.f32.mrb[85].mxu1  ;;  %2076 = vmatprep.mubr.bf16.mxu1 %v1778_v11  ;;  %v1771_v60 = vmax.f32 %v1630_v13, %v3044_v8 }
 0x3ac   :  { %v3045_v32 = vpop.f32.mrb[86].mxu1  ;;  %2077 = vmatmul.mubr.bf16.vlgmr.msra.gmra.mrb[88].mxu1 %v1777_v38  ;;  %v1769_v63 = vmax.f32 %v1628_v28, %v1750_v42  ;;  %v3283_v28 = vld [vmem:[%s4125_s8 + $0x38] sm:$0xff]  }
 0x3ad   :  { %v1772_v61 = vmax.f32 %v1631_v22, %v3045_v32  ;;  %2872 = vmatpush3.bf16.msra.mxu1 %v3261_v56  ;;  %v1753_v62 = vpop.f32.mrb[87].mxu1  ;;  %v3281_v22 = vld [vmem:[%s4125_s8 + $0x28] sm:$0xff]  }
 0x3ae   :  { %v1770_v12 = vmax.f32 %v1629_v16, %v1753_v62  ;;  %2873 = vmatprep.subr.bf16.mxu1 %v3262_v57 }
 0x3af   :  { %v1776_v3 = vmax.f32 %v1771_v60, %v1772_v61 }
 0x3b0   :  { %v1775_v2 = vmax.f32 %v1769_v63, %v1770_v12 }
 0x3b1   :  { %v1780_v5 = vpack.c.bf16 %v1776_v3, %v1776_v3  ;;  %2874 = vmatpush3.bf16.msra.mxu1 %v3263_v51 }
 0x3b2   :  { %2875 = vmatprep.subr.bf16.mxu1 %v3264_v0  ;;  %v1779_v23 = vpack.c.bf16 %v1775_v2, %v1775_v2 }
 0x3b3   :  { %2116 = vmatprep.mubr.bf16.mxu1 %v1780_v5 }
 0x3b5   :  { %2876 = vmatpush3.bf16.msra.mxu1 %v3265_v4 }
 0x3b6   :  { %2877 = vmatprep.subr.bf16.mxu1 %v3266_v6 }
 0x3b9   :  { %2878 = vmatpush3.bf16.msra.mxu1 %v3267_v7 }
 0x3ba   :  { %2879 = vmatprep.subr.bf16.mxu1 %v3268_v48 }
 0x3bd   :  { %2880 = vmatpush3.bf16.msra.mxu1 %v3269_v33 }
 0x3be   :  { %2881 = vmatprep.subr.bf16.mxu1 %v3270_v9 }
 0x3c1   :  { %2882 = vmatpush3.bf16.msra.mxu1 %v3271_v10 }
 0x3c2   :  { %2883 = vmatprep.subr.bf16.mxu1 %v3272_v1 }
 0x3c5   :  { %2884 = vmatpush3.bf16.msra.mxu1 %v3273_v52 }
 0x3c6   :  { %2885 = vmatprep.subr.bf16.mxu1 %v3274_v34 }
 0x3c9   :  { %2886 = vmatpush3.bf16.msra.mxu1 %v3275_v14 }
 0x3ca   :  { %3046 = vmatprep.subr.bf16.mxu1 %v3288_v31 }
 0x3cc   :  { %2117 = vmatmul.mubr.bf16.vlgmr.msra.gmra.mrb[92].mxu1 %v1779_v23 }
 0x3cd   :  { %3047 = vmatpush3.bf16.msra.mxu1 %v3276_v17  ;;  %3062 = vmatprep.mubr.msk.bf16.mxu1 %vm3289_vm0, %v3288_v31 }
 0x3ce   :  { %3048 = vmatprep.subr.bf16.mxu1 %v3288_v31 }
 0x3d1   :  { %3049 = vmatpush3.bf16.msra.mxu1 %v3277_v18 }
 0x3d2   :  { %3050 = vmatprep.subr.bf16.mxu1 %v3288_v31 }
 0x3d5   :  { %3051 = vmatpush3.bf16.msra.mxu1 %v3278_v20 }
 0x3d6   :  { %3052 = vmatprep.subr.bf16.mxu1 %v3288_v31 }
 0x3d9   :  { %3053 = vmatpush3.bf16.msra.mxu1 %v3279_v21 }
 0x3da   :  { %3054 = vmatprep.subr.bf16.mxu1 %v3288_v31 }
 0x3dd   :  { %3055 = vmatpush3.bf16.msra.mxu1 %v3280_v15 }
 0x3de   :  { %3056 = vmatprep.subr.bf16.mxu1 %v3288_v31 }
 0x3e1   :  { %3057 = vmatpush3.bf16.msra.mxu1 %v3281_v22 }
 0x3e2   :  { %3058 = vmatprep.subr.bf16.mxu1 %v3288_v31 }
 0x3e5   :  { %3059 = vmatpush3.bf16.msra.mxu1 %v3282_v24 }
 0x3e6   :  { %3060 = vmatprep.subr.bf16.mxu1 %v3288_v31 }
 0x3e9   :  { %3061 = vmatpush3.bf16.msra.mxu1 %v3283_v28 }
 0x47f   :  { %v2865_v16 = vpop.f32.mrb[88].mxu1 }
 0x480   :  { %v2866_v13 = vpop.f32.mrb[89].mxu1 }
 0x481   :  { %v2867_v29 = vadd.f32 %v2866_v13, %v2865_v16  ;;  %v2868_v43 = vpop.f32.mrb[90].mxu1 }
 0x482   :  { %v2869_v30 = vpop.f32.mrb[91].mxu1 }
 0x483   :  { %v2079_v37 = vadd.f32 %v2867_v29, %v2479_v19 }
 0x49f   :  { %v2887_v35 = vpop.f32.mrb[92].mxu1 }
 0x4a0   :  { %v2888_v36 = vpop.f32.mrb[93].mxu1 }
 0x4a1   :  { %v2889_v39 = vadd.f32 %v2888_v36, %v2887_v35  ;;  %v2890_v40 = vpop.f32.mrb[94].mxu1 }
 0x4a2   :  { %v2891_v27 = vpop.f32.mrb[95].mxu1 }
 0x4a3   :  { %v2119_v58 = vadd.f32 %v2889_v39, %v2079_v37 }
 0x4a5   :  { %v2124_v41 = vmax.f32 %v2119_v58, 0.0 }
 0x4a7   :  { %v2125_v44 = vpack.c.bf16 %v2124_v41, %v2124_v41 }
 0x4a9   :  { %3063 = vmatmul.mubr.bf16.vlgmr.msra.gmra.mrb[96].mxu1 %v2125_v44 }
 0x57c   :  { %v2231_v46 = vpop.f32.mrb[96].mxu1 }
 0x57d   :  { %v2232_v59 = vadd.f32 %v2512_v45, %v2231_v46  ;;  %v3064_v47 = vpop.f32.mrb[97].mxu1 }
 0x57e   :  { %v2234_v25 = vpop.f32.mrb[98].mxu1 }
 0x57f   :  { %2237 = vmax.xlane.f32.xlu0 %v2232_v59  ;;  %v3065_v49 = vpop.f32.mrb[99].mxu1 }
 0x60c   :  { %v2238_v50 = vpop.xlane.xlu0 %2237 }
 0x60d   :  { %v2239_v53 = vsub.f32 %v2232_v59, %v2238_v50 }
 0x60f   :  { %v2240_v26 = vmul.f32 1.442695, %v2239_v53 }
 0x611   :  { %3284 = vpow2.f32 %v2240_v26 }
 0x61b   :  { %v3285_v54 = vpop.eup %3284 }
 0x61c   :  { %2242 = vadd.xlane.f32.xlu0 %v3285_v54 }
 0x6a9   :  { %v2243_v55 = vpop.xlane.xlu0 %2242 }
 0x6aa   :  { %3286 = vlog2.f32 %v2243_v55 }
 0x6b4   :  { %v3287_v11 = vpop.eup %3286 }
 0x6b5   :  { %v2245_v56 = vmul.f32 0.6931472, %v3287_v11 }
 0x6b7   :  { %v2246_v38 = vadd.f32 %v2245_v56, %v2238_v50 }
 0x6b9   :  { %v2247_v8 = vsub.f32 %v2232_v59, %v2246_v38 }
 0x6bb   :  { %2248 = vst [vmem:[%s4128_s10] sm:$0xff] %v2247_v8 }

</bundles_post_ra>
